<compile_context>
chip_gen: v6e
topology: v6e:2x2x1
jax: 0.10.0
libtpu: 0.0.40
codegen_flags: <defaults>
</compile_context>

<pallas_src>
import math
import functools

import jax
import jax.numpy as jnp
from jax.experimental import pallas as pl
from jax.experimental.pallas import tpu as pltpu


CONFIG = dict(
    vocab_size=128,
    max_position=16,
    type_vocab_size=2,
    hidden=32,
    n_heads=4,
    n_layers=2,
    intermediate=64,
)


# ----------------------------------------------------------------------------
# Fused encoder kernel: one grid step == one full encoder over its whole batch
# ----------------------------------------------------------------------------

def _fused_encoder_kernel(x_ref, bias_ref, eg_ref, eb_ref,
                          wqkv_ref, bqkv_ref, wo_ref, bo_ref,
                          ln1g_ref, ln1b_ref,
                          w1_ref, b1_ref, w2_ref, b2_ref,
                          ln2g_ref, ln2b_ref,
                          out_ref,
                          *, n_layers, n_heads, batch, seq, eps):
    T, H = x_ref.shape                 # T = batch * seq  (whole slab)
    D = H // n_heads
    scale = 1.0 / math.sqrt(D)

    def layernorm(h, g, b):
        mu = jnp.mean(h, axis=-1, keepdims=True)
        var = jnp.mean(jnp.square(h - mu), axis=-1, keepdims=True)
        return (h - mu) * jax.lax.rsqrt(var + eps) * g + b

    def mm(a, w_bf16):
        # bf16 MXU matmul, f32 accumulation.
        return jnp.dot(a.astype(jnp.bfloat16), w_bf16,
                       preferred_element_type=jnp.float32)

    # Embedding LayerNorm (f32).
    h = layernorm(x_ref[...], eg_ref[0], eb_ref[0])

    # Additive bias (T, T): block-diagonal over sequences + key padding mask.
    bias = bias_ref[...]

    for l in range(n_layers):                  # static unroll (n_layers = 2)
        # ------------------ self attention ------------------
        qkv = mm(h, wqkv_ref[l]) + bqkv_ref[l]          # (T, 3H) value in vregs

        ctxs = []
        for hd in range(n_heads):              # static unroll, values only
            qh = qkv[:, hd * D:(hd + 1) * D]                    # (T, D)
            kh = qkv[:, H + hd * D:H + (hd + 1) * D]            # (T, D)
            vh = qkv[:, 2 * H + hd * D:2 * H + (hd + 1) * D]    # (T, D)

            sc = jax.lax.dot_general(
                qh.astype(jnp.bfloat16), kh.astype(jnp.bfloat16),
                (((1,), (1,)), ((), ())),
                preferred_element_type=jnp.float32)             # (T, T)
            sc = sc * scale + bias
            sc = sc - jnp.max(sc, axis=-1, keepdims=True)
            p = jnp.exp(sc)
            p = p * pl.reciprocal(jnp.sum(p, axis=-1, keepdims=True),
                                  approx=False)
            ctxs.append(jnp.dot(p.astype(jnp.bfloat16),
                                vh.astype(jnp.bfloat16),
                                preferred_element_type=jnp.float32))
        ctx = jnp.concatenate(ctxs, axis=-1)                    # (T, H)

        attn = mm(ctx, wo_ref[l]) + bo_ref[l]
        h = layernorm(attn + h, ln1g_ref[l], ln1b_ref[l])

        # ------------------ feed forward ------------------
        # TODO(synk): PyTorch BERT default is exact erf GELU; tanh approximation
        # is used here for a clean Mosaic lowering (numerically very close).
        ff = jax.nn.gelu(mm(h, w1_ref[l]) + b1_ref[l], approximate=True)
        ff = mm(ff, w2_ref[l]) + b2_ref[l]
        h = layernorm(ff + h, ln2g_ref[l], ln2b_ref[l])

    # Emit only the CLS rows (row b*seq of each sequence) -> (B, H).
    cls_rows = [h[b * seq:b * seq + 1, :] for b in range(batch)]
    out_ref[0] = jnp.concatenate(cls_rows, axis=0)


def _encoders_call(x, bias, w, E, B, S, cfg):
    H, I, L, NH = cfg["hidden"], cfg["intermediate"], cfg["n_layers"], cfg["n_heads"]
    T = B * S

    kernel = functools.partial(_fused_encoder_kernel,
                               n_layers=L, n_heads=NH,
                               batch=B, seq=S, eps=1e-12)

    m2 = lambda e: (e, 0)
    m3 = lambda e: (e, 0, 0)

    return pl.pallas_call(
        kernel,
        out_shape=jax.ShapeDtypeStruct((E, B, H), jnp.float32),
        grid=(E,),
        in_specs=[
            pl.BlockSpec((T, H), m2),            # embeddings slab   (E*T, H)
            pl.BlockSpec((T, T), m2),            # additive bias     (E*T, T)
            pl.BlockSpec((1, 1, H), m3),         # emb LN gamma      (E, 1, H)
            pl.BlockSpec((1, 1, H), m3),         # emb LN beta
            pl.BlockSpec((L, H, 3 * H), m3),     # wqkv (bf16)       (E*L, H, 3H)
            pl.BlockSpec((L, 1, 3 * H), m3),     # bqkv
            pl.BlockSpec((L, H, H), m3),         # wo   (bf16)
            pl.BlockSpec((L, 1, H), m3),         # bo
            pl.BlockSpec((L, 1, H), m3),         # attn LN gamma
            pl.BlockSpec((L, 1, H), m3),         # attn LN beta
            pl.BlockSpec((L, H, I), m3),         # w1   (bf16)
            pl.BlockSpec((L, 1, I), m3),         # b1
            pl.BlockSpec((L, I, H), m3),         # w2   (bf16)
            pl.BlockSpec((L, 1, H), m3),         # b2
            pl.BlockSpec((L, 1, H), m3),         # ffn LN gamma
            pl.BlockSpec((L, 1, H), m3),         # ffn LN beta
        ],
        out_specs=pl.BlockSpec((1, B, H), m3),   # CLS vectors       (E, B, H)
        compiler_params=pltpu.CompilerParams(
            dimension_semantics=("parallel",)),
    )(x, bias, w["emb_g"], w["emb_b"],
      w["wqkv"], w["bqkv"], w["wo"], w["bo"],
      w["ln1g"], w["ln1b"], w["w1"], w["b1"],
      w["w2"], w["b2"], w["ln2g"], w["ln2b"])


# ----------------------------------------------------------------------------
# Mini-BERT parameters and JAX-side glue (gathers / bias precompute, jitted)
# ----------------------------------------------------------------------------

def init_bert_params(key, cfg):
    H, I = cfg["hidden"], cfg["intermediate"]
    keys = iter(jax.random.split(key, 64))

    def w(shape, k):
        return jax.random.normal(k, shape, dtype=jnp.float32) * 0.02

    params = {
        "word_emb": w((cfg["vocab_size"], H), next(keys)),
        "pos_emb": w((cfg["max_position"], H), next(keys)),
        "type_emb": w((cfg["type_vocab_size"], H), next(keys)),
        "emb_ln_g": jnp.ones((1, H), jnp.float32),
        "emb_ln_b": jnp.zeros((1, H), jnp.float32),
        "layers": [],
    }
    for _ in range(cfg["n_layers"]):
        layer = {
            "wq": w((H, H), next(keys)), "bq": jnp.zeros((1, H), jnp.float32),
            "wk": w((H, H), next(keys)), "bk": jnp.zeros((1, H), jnp.float32),
            "wv": w((H, H), next(keys)), "bv": jnp.zeros((1, H), jnp.float32),
            "wo": w((H, H), next(keys)), "bo": jnp.zeros((1, H), jnp.float32),
            "attn_ln_g": jnp.ones((1, H), jnp.float32),
            "attn_ln_b": jnp.zeros((1, H), jnp.float32),
            "w1": w((H, I), next(keys)), "b1": jnp.zeros((1, I), jnp.float32),
            "w2": w((I, H), next(keys)), "b2": jnp.zeros((1, H), jnp.float32),
            "ffn_ln_g": jnp.ones((1, H), jnp.float32),
            "ffn_ln_b": jnp.zeros((1, H), jnp.float32),
        }
        params["layers"].append(layer)
    return params


def _stack_encoder_weights(params_list):
    """Stack per-encoder, per-layer weights along one leading axis; fuse QKV;
    cast matmul weights to bf16 (biases / LN params stay f32)."""
    wqkv, bqkv, wo, bo = [], [], [], []
    ln1g, ln1b, w1, b1, w2, b2, ln2g, ln2b = ([] for _ in range(8))
    emb_g, emb_b = [], []
    for params in params_list:
        emb_g.append(params["emb_ln_g"])
        emb_b.append(params["emb_ln_b"])
        for layer in params["layers"]:
            wqkv.append(jnp.concatenate(
                [layer["wq"], layer["wk"], layer["wv"]], axis=1))
            bqkv.append(jnp.concatenate(
                [layer["bq"], layer["bk"], layer["bv"]], axis=1))
            wo.append(layer["wo"]); bo.append(layer["bo"])
            ln1g.append(layer["attn_ln_g"]); ln1b.append(layer["attn_ln_b"])
            w1.append(layer["w1"]); b1.append(layer["b1"])
            w2.append(layer["w2"]); b2.append(layer["b2"])
            ln2g.append(layer["ffn_ln_g"]); ln2b.append(layer["ffn_ln_b"])

    f32 = lambda xs: jnp.stack(xs).astype(jnp.float32)
    bf16 = lambda xs: jnp.stack(xs).astype(jnp.bfloat16)
    return dict(
        emb_g=f32(emb_g), emb_b=f32(emb_b),          # (E, 1, H)
        wqkv=bf16(wqkv), bqkv=f32(bqkv),             # (E*L, H, 3H) / (E*L, 1, 3H)
        wo=bf16(wo), bo=f32(bo),
        ln1g=f32(ln1g), ln1b=f32(ln1b),
        w1=bf16(w1), b1=f32(b1),
        w2=bf16(w2), b2=f32(b2),
        ln2g=f32(ln2g), ln2b=f32(ln2b),
    )


def _embed(params, input_ids, cfg):
    # TODO(synk): embedding gathers stay in the jitted XLA prologue (fused with
    # the pallas_call by jit); a data-dependent in-kernel gather would need a
    # scalar-prefetch gather that is not worth it at these table sizes.
    B, S = input_ids.shape
    H = cfg["hidden"]
    word = params["word_emb"][input_ids]                     # [B, S, H]
    pos = params["pos_emb"][jnp.arange(S)][None, :, :]       # [1, S, H]
    typ = params["type_emb"][0][None, None, :]               # [1, 1, H]
    return (word + pos + typ).reshape(B * S, H).astype(jnp.float32)


def _block_diag_bias(attention_mask):
    """(B*S, B*S) additive bias: 0 where query/key belong to the same sequence
    and the key is not padding, -1e9 elsewhere."""
    B, S = attention_mask.shape
    T = B * S
    seq_id = jnp.arange(T) // S
    same_seq = seq_id[:, None] == seq_id[None, :]
    key_ok = attention_mask.reshape(T) > 0
    keep = same_seq & key_ok[None, :]
    return jnp.where(keep, 0.0, -1e9).astype(jnp.float32)


@jax.jit
def _forward_pair(params_claim, params_doc,
                  claim_ids, claim_mask, doc_ids, doc_mask):
    cfg = CONFIG
    B, S = claim_ids.shape
    x = jnp.concatenate([_embed(params_claim, claim_ids, cfg),
                         _embed(params_doc, doc_ids, cfg)], axis=0)
    bias = jnp.concatenate([_block_diag_bias(claim_mask),
                            _block_diag_bias(doc_mask)], axis=0)
    w = _stack_encoder_weights([params_claim, params_doc])
    cls = _encoders_call(x, bias, w, 2, B, S, cfg)           # (2, B, H)
    return cls[0], cls[1]


@jax.jit
def _forward_single(params, ids, mask):
    cfg = CONFIG
    B, S = ids.shape
    x = _embed(params, ids, cfg)
    bias = _block_diag_bias(mask)
    w = _stack_encoder_weights([params])
    return _encoders_call(x, bias, w, 1, B, S, cfg)[0]       # (B, H)


# ----------------------------------------------------------------------------
# DualEncoderBert forward
# ----------------------------------------------------------------------------

def dual_encoder_forward(params_claim, params_doc,
                         claim_input_ids=None, claim_attention_mask=None,
                         doc_input_ids=None, doc_attention_mask=None):
    have_claim = claim_input_ids is not None and claim_attention_mask is not None
    have_doc = doc_input_ids is not None and doc_attention_mask is not None

    if have_claim and have_doc and claim_input_ids.shape == doc_input_ids.shape:
        return _forward_pair(params_claim, params_doc,
                             claim_input_ids, claim_attention_mask,
                             doc_input_ids, doc_attention_mask)

    claim_out = (_forward_single(params_claim, claim_input_ids,
                                 claim_attention_mask) if have_claim else None)
    doc_out = (_forward_single(params_doc, doc_input_ids,
                               doc_attention_mask) if have_doc else None)
    return claim_out, doc_out

# TODO(synk): tokenize_text (BertTokenizer) is host-side string processing with
# no Pallas equivalent; token ids are generated synthetically below.


if __name__ == "__main__":
    B, S = 2, 8
    key = jax.random.PRNGKey(0)
    k_claim, k_doc, k_ids1, k_ids2 = jax.random.split(key, 4)

    params_claim = init_bert_params(k_claim, CONFIG)
    params_doc = init_bert_params(k_doc, CONFIG)

    claim_ids = jax.random.randint(k_ids1, (B, S), 0, CONFIG["vocab_size"],
                                   dtype=jnp.int32)
    doc_ids = jax.random.randint(k_ids2, (B, S), 0, CONFIG["vocab_size"],
                                 dtype=jnp.int32)
    # last two claim tokens of sequence 1 are padding, to exercise the mask
    claim_mask = jnp.array([[1] * S, [1] * (S - 2) + [0, 0]], dtype=jnp.int32)
    doc_mask = jnp.ones((B, S), dtype=jnp.int32)

    claim_out, doc_out = dual_encoder_forward(
        params_claim, params_doc,
        claim_input_ids=claim_ids, claim_attention_mask=claim_mask,
        doc_input_ids=doc_ids, doc_attention_mask=doc_mask,
    )

    jax.block_until_ready((claim_out, doc_out))
    assert claim_out.shape == (B, CONFIG["hidden"])
    assert doc_out.shape == (B, CONFIG["hidden"])
    assert bool(jnp.all(jnp.isfinite(claim_out))) and bool(jnp.all(jnp.isfinite(doc_out)))
    print("KERNEL_OK")
</pallas_src>

<mosaic_0001>
module attributes {stable_mosaic.version = 11 : i64} {
  func.func @_fused_encoder_kernel(%arg0: i32, %arg1: memref<16x32xf32, #tpu.memory_space<vmem>>, %arg2: memref<16x16xf32, #tpu.memory_space<vmem>>, %arg3: memref<1x1x32xf32, #tpu.memory_space<vmem>>, %arg4: memref<1x1x32xf32, #tpu.memory_space<vmem>>, %arg5: memref<2x32x96xbf16, #tpu.memory_space<vmem>>, %arg6: memref<2x1x96xf32, #tpu.memory_space<vmem>>, %arg7: memref<2x32x32xbf16, #tpu.memory_space<vmem>>, %arg8: memref<2x1x32xf32, #tpu.memory_space<vmem>>, %arg9: memref<2x1x32xf32, #tpu.memory_space<vmem>>, %arg10: memref<2x1x32xf32, #tpu.memory_space<vmem>>, %arg11: memref<2x32x64xbf16, #tpu.memory_space<vmem>>, %arg12: memref<2x1x64xf32, #tpu.memory_space<vmem>>, %arg13: memref<2x64x32xbf16, #tpu.memory_space<vmem>>, %arg14: memref<2x1x32xf32, #tpu.memory_space<vmem>>, %arg15: memref<2x1x32xf32, #tpu.memory_space<vmem>>, %arg16: memref<2x1x32xf32, #tpu.memory_space<vmem>>, %arg17: memref<1x2x32xf32, #tpu.memory_space<vmem>>) attributes {dimension_semantics = [#tpu.dimension_semantics<parallel>], iteration_bounds = array<i64: 2>, scalar_prefetch = 0 : i64, scratch_operands = 0 : i64, tpu.core_type = #tpu.core_type<tc>, window_params = [{transform_indices = @transform_0, window_bounds = array<i64: 16, 32>}, {transform_indices = @transform_1, window_bounds = array<i64: 16, 16>}, {transform_indices = @transform_2, window_bounds = array<i64: 1, 1, 32>}, {transform_indices = @transform_3, window_bounds = array<i64: 1, 1, 32>}, {transform_indices = @transform_4, window_bounds = array<i64: 2, 32, 96>}, {transform_indices = @transform_5, window_bounds = array<i64: 2, 1, 96>}, {transform_indices = @transform_6, window_bounds = array<i64: 2, 32, 32>}, {transform_indices = @transform_7, window_bounds = array<i64: 2, 1, 32>}, {transform_indices = @transform_8, window_bounds = array<i64: 2, 1, 32>}, {transform_indices = @transform_9, window_bounds = array<i64: 2, 1, 32>}, {transform_indices = @transform_10, window_bounds = array<i64: 2, 32, 64>}, {transform_indices = @transform_11, window_bounds = array<i64: 2, 1, 64>}, {transform_indices = @transform_12, window_bounds = array<i64: 2, 64, 32>}, {transform_indices = @transform_13, window_bounds = array<i64: 2, 1, 32>}, {transform_indices = @transform_14, window_bounds = array<i64: 2, 1, 32>}, {transform_indices = @transform_15, window_bounds = array<i64: 2, 1, 32>}, {transform_indices = @transform_16, window_bounds = array<i64: 1, 2, 32>}]} {
    %c0 = arith.constant 0 : index
    %c0_0 = arith.constant 0 : index
    %0 = vector.load %arg1[%c0, %c0_0] : memref<16x32xf32, #tpu.memory_space<vmem>>, vector<16x32xf32>
    %c0_1 = arith.constant 0 : index
    %c0_2 = arith.constant 0 : index
    %c0_3 = arith.constant 0 : index
    %1 = vector.load %arg3[%c0_1, %c0_2, %c0_3] : memref<1x1x32xf32, #tpu.memory_space<vmem>>, vector<1x1x32xf32>
    %2 = vector.shape_cast %1 : vector<1x1x32xf32> to vector<1x32xf32>
    %c0_4 = arith.constant 0 : index
    %c0_5 = arith.constant 0 : index
    %c0_6 = arith.constant 0 : index
    %3 = vector.load %arg4[%c0_4, %c0_5, %c0_6] : memref<1x1x32xf32, #tpu.memory_space<vmem>>, vector<1x1x32xf32>
    %4 = vector.shape_cast %3 : vector<1x1x32xf32> to vector<1x32xf32>
    %cst = arith.constant dense<0.000000e+00> : vector<16xf32>
    %5 = vector.multi_reduction <add>, %0, %cst [1] : vector<16x32xf32> to vector<16xf32>
    %6 = vector.shape_cast %5 : vector<16xf32> to vector<16x1xf32>
    %cst_7 = arith.constant 3.200000e+01 : f32
    %7 = vector.broadcast %cst_7 : f32 to vector<16x1xf32>
    %8 = arith.divf %6, %7 : vector<16x1xf32>
    %9 = vector.broadcast %8 : vector<16x1xf32> to vector<16x32xf32>
    %10 = arith.subf %0, %9 : vector<16x32xf32>
    %11 = arith.mulf %10, %10 : vector<16x32xf32>
    %cst_8 = arith.constant dense<0.000000e+00> : vector<16xf32>
    %12 = vector.multi_reduction <add>, %11, %cst_8 [1] : vector<16x32xf32> to vector<16xf32>
    %13 = vector.shape_cast %12 : vector<16xf32> to vector<16x1xf32>
    %cst_9 = arith.constant 3.200000e+01 : f32
    %14 = vector.broadcast %cst_9 : f32 to vector<16x1xf32>
    %15 = arith.divf %13, %14 : vector<16x1xf32>
    %16 = vector.broadcast %8 : vector<16x1xf32> to vector<16x32xf32>
    %17 = arith.subf %0, %16 : vector<16x32xf32>
    %cst_10 = arith.constant 9.99999996E-13 : f32
    %18 = vector.broadcast %cst_10 : f32 to vector<16x1xf32>
    %19 = arith.addf %15, %18 : vector<16x1xf32>
    %20 = math.rsqrt %19 : vector<16x1xf32>
    %21 = vector.broadcast %20 : vector<16x1xf32> to vector<16x32xf32>
    %22 = arith.mulf %17, %21 : vector<16x32xf32>
    %23 = vector.broadcast %2 : vector<1x32xf32> to vector<16x32xf32>
    %24 = arith.mulf %22, %23 : vector<16x32xf32>
    %25 = vector.broadcast %4 : vector<1x32xf32> to vector<16x32xf32>
    %26 = arith.addf %24, %25 : vector<16x32xf32>
    %c0_11 = arith.constant 0 : index
    %c0_12 = arith.constant 0 : index
    %27 = vector.load %arg2[%c0_11, %c0_12] : memref<16x16xf32, #tpu.memory_space<vmem>>, vector<16x16xf32>
    %c0_13 = arith.constant 0 : index
    %c0_14 = arith.constant 0 : index
    %c0_15 = arith.constant 0 : index
    %28 = vector.load %arg5[%c0_13, %c0_14, %c0_15] : memref<2x32x96xbf16, #tpu.memory_space<vmem>>, vector<1x32x96xbf16>
    %29 = vector.shape_cast %28 : vector<1x32x96xbf16> to vector<32x96xbf16>
    %30 = arith.truncf %26 : vector<16x32xf32> to vector<16x32xbf16>
    %cst_16 = arith.constant dense<0.000000e+00> : vector<16x96xf32>
    %31 = tpu.matmul %30, %29, %cst_16 {dimension_numbers = #tpu.dot_dimension_numbers<[1], [0], [0], [1], [0, 0, 1, 1], [], []>} : vector<16x32xbf16>, vector<32x96xbf16>, vector<16x96xf32> -> vector<16x96xf32>
    %c0_17 = arith.constant 0 : index
    %c0_18 = arith.constant 0 : index
    %c0_19 = arith.constant 0 : index
    %32 = vector.load %arg6[%c0_17, %c0_18, %c0_19] : memref<2x1x96xf32, #tpu.memory_space<vmem>>, vector<1x1x96xf32>
    %33 = vector.shape_cast %32 : vector<1x1x96xf32> to vector<1x96xf32>
    %34 = vector.broadcast %33 : vector<1x96xf32> to vector<16x96xf32>
    %35 = arith.addf %31, %34 : vector<16x96xf32>
    %36 = vector.extract_strided_slice %35 {offsets = [0, 0], sizes = [16, 8], strides = [1, 1]} : vector<16x96xf32> to vector<16x8xf32>
    %37 = vector.extract_strided_slice %35 {offsets = [0, 32], sizes = [16, 8], strides = [1, 1]} : vector<16x96xf32> to vector<16x8xf32>
    %38 = vector.extract_strided_slice %35 {offsets = [0, 64], sizes = [16, 8], strides = [1, 1]} : vector<16x96xf32> to vector<16x8xf32>
    %39 = arith.truncf %36 : vector<16x8xf32> to vector<16x8xbf16>
    %40 = arith.truncf %37 : vector<16x8xf32> to vector<16x8xbf16>
    %cst_20 = arith.constant dense<0.000000e+00> : vector<16x16xf32>
    %41 = tpu.matmul %39, %40, %cst_20 {dimension_numbers = #tpu.dot_dimension_numbers<[1], [1], [0], [0], [0, 0, 1, 0], [], []>} : vector<16x8xbf16>, vector<16x8xbf16>, vector<16x16xf32> -> vector<16x16xf32>
    %cst_21 = arith.constant 0.353553385 : f32
    %42 = vector.broadcast %cst_21 : f32 to vector<16x16xf32>
    %43 = arith.mulf %41, %42 : vector<16x16xf32>
    %44 = arith.addf %43, %27 : vector<16x16xf32>
    %cst_22 = arith.constant dense<0xFF800000> : vector<16xf32>
    %45 = vector.multi_reduction <maximumf>, %44, %cst_22 [1] : vector<16x16xf32> to vector<16xf32>
    %46 = vector.shape_cast %45 : vector<16xf32> to vector<16x1xf32>
    %47 = vector.broadcast %46 : vector<16x1xf32> to vector<16x16xf32>
    %48 = arith.subf %44, %47 : vector<16x16xf32>
    %49 = math.exp %48 : vector<16x16xf32>
    %cst_23 = arith.constant dense<0.000000e+00> : vector<16xf32>
    %50 = vector.multi_reduction <add>, %49, %cst_23 [1] : vector<16x16xf32> to vector<16xf32>
    %51 = vector.shape_cast %50 : vector<16xf32> to vector<16x1xf32>
    %52 = tpu.reciprocal %51 : vector<16x1xf32> -> vector<16x1xf32>
    %53 = vector.broadcast %52 : vector<16x1xf32> to vector<16x16xf32>
    %54 = arith.mulf %49, %53 : vector<16x16xf32>
    %55 = arith.truncf %54 : vector<16x16xf32> to vector<16x16xbf16>
    %56 = arith.truncf %38 : vector<16x8xf32> to vector<16x8xbf16>
    %cst_24 = arith.constant dense<0.000000e+00> : vector<16x8xf32>
    %57 = tpu.matmul %55, %56, %cst_24 {dimension_numbers = #tpu.dot_dimension_numbers<[1], [0], [0], [1], [0, 0, 1, 1], [], []>} : vector<16x16xbf16>, vector<16x8xbf16>, vector<16x8xf32> -> vector<16x8xf32>
    %58 = vector.extract_strided_slice %35 {offsets = [0, 8], sizes = [16, 8], strides = [1, 1]} : vector<16x96xf32> to vector<16x8xf32>
    %59 = vector.extract_strided_slice %35 {offsets = [0, 40], sizes = [16, 8], strides = [1, 1]} : vector<16x96xf32> to vector<16x8xf32>
    %60 = vector.extract_strided_slice %35 {offsets = [0, 72], sizes = [16, 8], strides = [1, 1]} : vector<16x96xf32> to vector<16x8xf32>
    %61 = arith.truncf %58 : vector<16x8xf32> to vector<16x8xbf16>
    %62 = arith.truncf %59 : vector<16x8xf32> to vector<16x8xbf16>
    %cst_25 = arith.constant dense<0.000000e+00> : vector<16x16xf32>
    %63 = tpu.matmul %61, %62, %cst_25 {dimension_numbers = #tpu.dot_dimension_numbers<[1], [1], [0], [0], [0, 0, 1, 0], [], []>} : vector<16x8xbf16>, vector<16x8xbf16>, vector<16x16xf32> -> vector<16x16xf32>
    %cst_26 = arith.constant 0.353553385 : f32
    %64 = vector.broadcast %cst_26 : f32 to vector<16x16xf32>
    %65 = arith.mulf %63, %64 : vector<16x16xf32>
    %66 = arith.addf %65, %27 : vector<16x16xf32>
    %cst_27 = arith.constant dense<0xFF800000> : vector<16xf32>
    %67 = vector.multi_reduction <maximumf>, %66, %cst_27 [1] : vector<16x16xf32> to vector<16xf32>
    %68 = vector.shape_cast %67 : vector<16xf32> to vector<16x1xf32>
    %69 = vector.broadcast %68 : vector<16x1xf32> to vector<16x16xf32>
    %70 = arith.subf %66, %69 : vector<16x16xf32>
    %71 = math.exp %70 : vector<16x16xf32>
    %cst_28 = arith.constant dense<0.000000e+00> : vector<16xf32>
    %72 = vector.multi_reduction <add>, %71, %cst_28 [1] : vector<16x16xf32> to vector<16xf32>
    %73 = vector.shape_cast %72 : vector<16xf32> to vector<16x1xf32>
    %74 = tpu.reciprocal %73 : vector<16x1xf32> -> vector<16x1xf32>
    %75 = vector.broadcast %74 : vector<16x1xf32> to vector<16x16xf32>
    %76 = arith.mulf %71, %75 : vector<16x16xf32>
    %77 = arith.truncf %76 : vector<16x16xf32> to vector<16x16xbf16>
    %78 = arith.truncf %60 : vector<16x8xf32> to vector<16x8xbf16>
    %cst_29 = arith.constant dense<0.000000e+00> : vector<16x8xf32>
    %79 = tpu.matmul %77, %78, %cst_29 {dimension_numbers = #tpu.dot_dimension_numbers<[1], [0], [0], [1], [0, 0, 1, 1], [], []>} : vector<16x16xbf16>, vector<16x8xbf16>, vector<16x8xf32> -> vector<16x8xf32>
    %80 = vector.extract_strided_slice %35 {offsets = [0, 16], sizes = [16, 8], strides = [1, 1]} : vector<16x96xf32> to vector<16x8xf32>
    %81 = vector.extract_strided_slice %35 {offsets = [0, 48], sizes = [16, 8], strides = [1, 1]} : vector<16x96xf32> to vector<16x8xf32>
    %82 = vector.extract_strided_slice %35 {offsets = [0, 80], sizes = [16, 8], strides = [1, 1]} : vector<16x96xf32> to vector<16x8xf32>
    %83 = arith.truncf %80 : vector<16x8xf32> to vector<16x8xbf16>
    %84 = arith.truncf %81 : vector<16x8xf32> to vector<16x8xbf16>
    %cst_30 = arith.constant dense<0.000000e+00> : vector<16x16xf32>
    %85 = tpu.matmul %83, %84, %cst_30 {dimension_numbers = #tpu.dot_dimension_numbers<[1], [1], [0], [0], [0, 0, 1, 0], [], []>} : vector<16x8xbf16>, vector<16x8xbf16>, vector<16x16xf32> -> vector<16x16xf32>
    %cst_31 = arith.constant 0.353553385 : f32
    %86 = vector.broadcast %cst_31 : f32 to vector<16x16xf32>
    %87 = arith.mulf %85, %86 : vector<16x16xf32>
    %88 = arith.addf %87, %27 : vector<16x16xf32>
    %cst_32 = arith.constant dense<0xFF800000> : vector<16xf32>
    %89 = vector.multi_reduction <maximumf>, %88, %cst_32 [1] : vector<16x16xf32> to vector<16xf32>
    %90 = vector.shape_cast %89 : vector<16xf32> to vector<16x1xf32>
    %91 = vector.broadcast %90 : vector<16x1xf32> to vector<16x16xf32>
    %92 = arith.subf %88, %91 : vector<16x16xf32>
    %93 = math.exp %92 : vector<16x16xf32>
    %cst_33 = arith.constant dense<0.000000e+00> : vector<16xf32>
    %94 = vector.multi_reduction <add>, %93, %cst_33 [1] : vector<16x16xf32> to vector<16xf32>
    %95 = vector.shape_cast %94 : vector<16xf32> to vector<16x1xf32>
    %96 = tpu.reciprocal %95 : vector<16x1xf32> -> vector<16x1xf32>
    %97 = vector.broadcast %96 : vector<16x1xf32> to vector<16x16xf32>
    %98 = arith.mulf %93, %97 : vector<16x16xf32>
    %99 = arith.truncf %98 : vector<16x16xf32> to vector<16x16xbf16>
    %100 = arith.truncf %82 : vector<16x8xf32> to vector<16x8xbf16>
    %cst_34 = arith.constant dense<0.000000e+00> : vector<16x8xf32>
    %101 = tpu.matmul %99, %100, %cst_34 {dimension_numbers = #tpu.dot_dimension_numbers<[1], [0], [0], [1], [0, 0, 1, 1], [], []>} : vector<16x16xbf16>, vector<16x8xbf16>, vector<16x8xf32> -> vector<16x8xf32>
    %102 = vector.extract_strided_slice %35 {offsets = [0, 24], sizes = [16, 8], strides = [1, 1]} : vector<16x96xf32> to vector<16x8xf32>
    %103 = vector.extract_strided_slice %35 {offsets = [0, 56], sizes = [16, 8], strides = [1, 1]} : vector<16x96xf32> to vector<16x8xf32>
    %104 = vector.extract_strided_slice %35 {offsets = [0, 88], sizes = [16, 8], strides = [1, 1]} : vector<16x96xf32> to vector<16x8xf32>
    %105 = arith.truncf %102 : vector<16x8xf32> to vector<16x8xbf16>
    %106 = arith.truncf %103 : vector<16x8xf32> to vector<16x8xbf16>
    %cst_35 = arith.constant dense<0.000000e+00> : vector<16x16xf32>
    %107 = tpu.matmul %105, %106, %cst_35 {dimension_numbers = #tpu.dot_dimension_numbers<[1], [1], [0], [0], [0, 0, 1, 0], [], []>} : vector<16x8xbf16>, vector<16x8xbf16>, vector<16x16xf32> -> vector<16x16xf32>
    %cst_36 = arith.constant 0.353553385 : f32
    %108 = vector.broadcast %cst_36 : f32 to vector<16x16xf32>
    %109 = arith.mulf %107, %108 : vector<16x16xf32>
    %110 = arith.addf %109, %27 : vector<16x16xf32>
    %cst_37 = arith.constant dense<0xFF800000> : vector<16xf32>
    %111 = vector.multi_reduction <maximumf>, %110, %cst_37 [1] : vector<16x16xf32> to vector<16xf32>
    %112 = vector.shape_cast %111 : vector<16xf32> to vector<16x1xf32>
    %113 = vector.broadcast %112 : vector<16x1xf32> to vector<16x16xf32>
    %114 = arith.subf %110, %113 : vector<16x16xf32>
    %115 = math.exp %114 : vector<16x16xf32>
    %cst_38 = arith.constant dense<0.000000e+00> : vector<16xf32>
    %116 = vector.multi_reduction <add>, %115, %cst_38 [1] : vector<16x16xf32> to vector<16xf32>
    %117 = vector.shape_cast %116 : vector<16xf32> to vector<16x1xf32>
    %118 = tpu.reciprocal %117 : vector<16x1xf32> -> vector<16x1xf32>
    %119 = vector.broadcast %118 : vector<16x1xf32> to vector<16x16xf32>
    %120 = arith.mulf %115, %119 : vector<16x16xf32>
    %121 = arith.truncf %120 : vector<16x16xf32> to vector<16x16xbf16>
    %122 = arith.truncf %104 : vector<16x8xf32> to vector<16x8xbf16>
    %cst_39 = arith.constant dense<0.000000e+00> : vector<16x8xf32>
    %123 = tpu.matmul %121, %122, %cst_39 {dimension_numbers = #tpu.dot_dimension_numbers<[1], [0], [0], [1], [0, 0, 1, 1], [], []>} : vector<16x16xbf16>, vector<16x8xbf16>, vector<16x8xf32> -> vector<16x8xf32>
    %124 = tpu.concatenate %57, %79, %101, %123 in 1 : vector<16x8xf32>, vector<16x8xf32>, vector<16x8xf32>, vector<16x8xf32> -> vector<16x32xf32>
    %c0_40 = arith.constant 0 : index
    %c0_41 = arith.constant 0 : index
    %c0_42 = arith.constant 0 : index
    %125 = vector.load %arg7[%c0_40, %c0_41, %c0_42] : memref<2x32x32xbf16, #tpu.memory_space<vmem>>, vector<1x32x32xbf16>
    %126 = vector.shape_cast %125 : vector<1x32x32xbf16> to vector<32x32xbf16>
    %127 = arith.truncf %124 : vector<16x32xf32> to vector<16x32xbf16>
    %cst_43 = arith.constant dense<0.000000e+00> : vector<16x32xf32>
    %128 = tpu.matmul %127, %126, %cst_43 {dimension_numbers = #tpu.dot_dimension_numbers<[1], [0], [0], [1], [0, 0, 1, 1], [], []>} : vector<16x32xbf16>, vector<32x32xbf16>, vector<16x32xf32> -> vector<16x32xf32>
    %c0_44 = arith.constant 0 : index
    %c0_45 = arith.constant 0 : index
    %c0_46 = arith.constant 0 : index
    %129 = vector.load %arg8[%c0_44, %c0_45, %c0_46] : memref<2x1x32xf32, #tpu.memory_space<vmem>>, vector<1x1x32xf32>
    %130 = vector.shape_cast %129 : vector<1x1x32xf32> to vector<1x32xf32>
    %131 = vector.broadcast %130 : vector<1x32xf32> to vector<16x32xf32>
    %132 = arith.addf %128, %131 : vector<16x32xf32>
    %133 = arith.addf %132, %26 : vector<16x32xf32>
    %c0_47 = arith.constant 0 : index
    %c0_48 = arith.constant 0 : index
    %c0_49 = arith.constant 0 : index
    %134 = vector.load %arg9[%c0_47, %c0_48, %c0_49] : memref<2x1x32xf32, #tpu.memory_space<vmem>>, vector<1x1x32xf32>
    %135 = vector.shape_cast %134 : vector<1x1x32xf32> to vector<1x32xf32>
    %c0_50 = arith.constant 0 : index
    %c0_51 = arith.constant 0 : index
    %c0_52 = arith.constant 0 : index
    %136 = vector.load %arg10[%c0_50, %c0_51, %c0_52] : memref<2x1x32xf32, #tpu.memory_space<vmem>>, vector<1x1x32xf32>
    %137 = vector.shape_cast %136 : vector<1x1x32xf32> to vector<1x32xf32>
    %cst_53 = arith.constant dense<0.000000e+00> : vector<16xf32>
    %138 = vector.multi_reduction <add>, %133, %cst_53 [1] : vector<16x32xf32> to vector<16xf32>
    %139 = vector.shape_cast %138 : vector<16xf32> to vector<16x1xf32>
    %cst_54 = arith.constant 3.200000e+01 : f32
    %140 = vector.broadcast %cst_54 : f32 to vector<16x1xf32>
    %141 = arith.divf %139, %140 : vector<16x1xf32>
    %142 = vector.broadcast %141 : vector<16x1xf32> to vector<16x32xf32>
    %143 = arith.subf %133, %142 : vector<16x32xf32>
    %144 = arith.mulf %143, %143 : vector<16x32xf32>
    %cst_55 = arith.constant dense<0.000000e+00> : vector<16xf32>
    %145 = vector.multi_reduction <add>, %144, %cst_55 [1] : vector<16x32xf32> to vector<16xf32>
    %146 = vector.shape_cast %145 : vector<16xf32> to vector<16x1xf32>
    %cst_56 = arith.constant 3.200000e+01 : f32
    %147 = vector.broadcast %cst_56 : f32 to vector<16x1xf32>
    %148 = arith.divf %146, %147 : vector<16x1xf32>
    %149 = vector.broadcast %141 : vector<16x1xf32> to vector<16x32xf32>
    %150 = arith.subf %133, %149 : vector<16x32xf32>
    %cst_57 = arith.constant 9.99999996E-13 : f32
    %151 = vector.broadcast %cst_57 : f32 to vector<16x1xf32>
    %152 = arith.addf %148, %151 : vector<16x1xf32>
    %153 = math.rsqrt %152 : vector<16x1xf32>
    %154 = vector.broadcast %153 : vector<16x1xf32> to vector<16x32xf32>
    %155 = arith.mulf %150, %154 : vector<16x32xf32>
    %156 = vector.broadcast %135 : vector<1x32xf32> to vector<16x32xf32>
    %157 = arith.mulf %155, %156 : vector<16x32xf32>
    %158 = vector.broadcast %137 : vector<1x32xf32> to vector<16x32xf32>
    %159 = arith.addf %157, %158 : vector<16x32xf32>
    %c0_58 = arith.constant 0 : index
    %c0_59 = arith.constant 0 : index
    %c0_60 = arith.constant 0 : index
    %160 = vector.load %arg11[%c0_58, %c0_59, %c0_60] : memref<2x32x64xbf16, #tpu.memory_space<vmem>>, vector<1x32x64xbf16>
    %161 = vector.shape_cast %160 : vector<1x32x64xbf16> to vector<32x64xbf16>
    %162 = arith.truncf %159 : vector<16x32xf32> to vector<16x32xbf16>
    %cst_61 = arith.constant dense<0.000000e+00> : vector<16x64xf32>
    %163 = tpu.matmul %162, %161, %cst_61 {dimension_numbers = #tpu.dot_dimension_numbers<[1], [0], [0], [1], [0, 0, 1, 1], [], []>} : vector<16x32xbf16>, vector<32x64xbf16>, vector<16x64xf32> -> vector<16x64xf32>
    %c0_62 = arith.constant 0 : index
    %c0_63 = arith.constant 0 : index
    %c0_64 = arith.constant 0 : index
    %164 = vector.load %arg12[%c0_62, %c0_63, %c0_64] : memref<2x1x64xf32, #tpu.memory_space<vmem>>, vector<1x1x64xf32>
    %165 = vector.shape_cast %164 : vector<1x1x64xf32> to vector<1x64xf32>
    %166 = vector.broadcast %165 : vector<1x64xf32> to vector<16x64xf32>
    %167 = arith.addf %163, %166 : vector<16x64xf32>
    %168 = arith.mulf %167, %167 : vector<16x64xf32>
    %169 = arith.mulf %167, %168 : vector<16x64xf32>
    %cst_65 = arith.constant 4.471500e-02 : f32
    %170 = vector.broadcast %cst_65 : f32 to vector<16x64xf32>
    %171 = arith.mulf %170, %169 : vector<16x64xf32>
    %172 = arith.addf %167, %171 : vector<16x64xf32>
    %cst_66 = arith.constant 0.797884583 : f32
    %173 = vector.broadcast %cst_66 : f32 to vector<16x64xf32>
    %174 = arith.mulf %173, %172 : vector<16x64xf32>
    %175 = math.tanh %174 : vector<16x64xf32>
    %cst_67 = arith.constant 1.000000e+00 : f32
    %176 = vector.broadcast %cst_67 : f32 to vector<16x64xf32>
    %177 = arith.addf %176, %175 : vector<16x64xf32>
    %cst_68 = arith.constant 5.000000e-01 : f32
    %178 = vector.broadcast %cst_68 : f32 to vector<16x64xf32>
    %179 = arith.mulf %178, %177 : vector<16x64xf32>
    %180 = arith.mulf %167, %179 : vector<16x64xf32>
    %c0_69 = arith.constant 0 : index
    %c0_70 = arith.constant 0 : index
    %c0_71 = arith.constant 0 : index
    %181 = vector.load %arg13[%c0_69, %c0_70, %c0_71] : memref<2x64x32xbf16, #tpu.memory_space<vmem>>, vector<1x64x32xbf16>
    %182 = vector.shape_cast %181 : vector<1x64x32xbf16> to vector<64x32xbf16>
    %183 = arith.truncf %180 : vector<16x64xf32> to vector<16x64xbf16>
    %cst_72 = arith.constant dense<0.000000e+00> : vector<16x32xf32>
    %184 = tpu.matmul %183, %182, %cst_72 {dimension_numbers = #tpu.dot_dimension_numbers<[1], [0], [0], [1], [0, 0, 1, 1], [], []>} : vector<16x64xbf16>, vector<64x32xbf16>, vector<16x32xf32> -> vector<16x32xf32>
    %c0_73 = arith.constant 0 : index
    %c0_74 = arith.constant 0 : index
    %c0_75 = arith.constant 0 : index
    %185 = vector.load %arg14[%c0_73, %c0_74, %c0_75] : memref<2x1x32xf32, #tpu.memory_space<vmem>>, vector<1x1x32xf32>
    %186 = vector.shape_cast %185 : vector<1x1x32xf32> to vector<1x32xf32>
    %187 = vector.broadcast %186 : vector<1x32xf32> to vector<16x32xf32>
    %188 = arith.addf %184, %187 : vector<16x32xf32>
    %189 = arith.addf %188, %159 : vector<16x32xf32>
    %c0_76 = arith.constant 0 : index
    %c0_77 = arith.constant 0 : index
    %c0_78 = arith.constant 0 : index
    %190 = vector.load %arg15[%c0_76, %c0_77, %c0_78] : memref<2x1x32xf32, #tpu.memory_space<vmem>>, vector<1x1x32xf32>
    %191 = vector.shape_cast %190 : vector<1x1x32xf32> to vector<1x32xf32>
    %c0_79 = arith.constant 0 : index
    %c0_80 = arith.constant 0 : index
    %c0_81 = arith.constant 0 : index
    %192 = vector.load %arg16[%c0_79, %c0_80, %c0_81] : memref<2x1x32xf32, #tpu.memory_space<vmem>>, vector<1x1x32xf32>
    %193 = vector.shape_cast %192 : vector<1x1x32xf32> to vector<1x32xf32>
    %cst_82 = arith.constant dense<0.000000e+00> : vector<16xf32>
    %194 = vector.multi_reduction <add>, %189, %cst_82 [1] : vector<16x32xf32> to vector<16xf32>
    %195 = vector.shape_cast %194 : vector<16xf32> to vector<16x1xf32>
    %cst_83 = arith.constant 3.200000e+01 : f32
    %196 = vector.broadcast %cst_83 : f32 to vector<16x1xf32>
    %197 = arith.divf %195, %196 : vector<16x1xf32>
    %198 = vector.broadcast %197 : vector<16x1xf32> to vector<16x32xf32>
    %199 = arith.subf %189, %198 : vector<16x32xf32>
    %200 = arith.mulf %199, %199 : vector<16x32xf32>
    %cst_84 = arith.constant dense<0.000000e+00> : vector<16xf32>
    %201 = vector.multi_reduction <add>, %200, %cst_84 [1] : vector<16x32xf32> to vector<16xf32>
    %202 = vector.shape_cast %201 : vector<16xf32> to vector<16x1xf32>
    %cst_85 = arith.constant 3.200000e+01 : f32
    %203 = vector.broadcast %cst_85 : f32 to vector<16x1xf32>
    %204 = arith.divf %202, %203 : vector<16x1xf32>
    %205 = vector.broadcast %197 : vector<16x1xf32> to vector<16x32xf32>
    %206 = arith.subf %189, %205 : vector<16x32xf32>
    %cst_86 = arith.constant 9.99999996E-13 : f32
    %207 = vector.broadcast %cst_86 : f32 to vector<16x1xf32>
    %208 = arith.addf %204, %207 : vector<16x1xf32>
    %209 = math.rsqrt %208 : vector<16x1xf32>
    %210 = vector.broadcast %209 : vector<16x1xf32> to vector<16x32xf32>
    %211 = arith.mulf %206, %210 : vector<16x32xf32>
    %212 = vector.broadcast %191 : vector<1x32xf32> to vector<16x32xf32>
    %213 = arith.mulf %211, %212 : vector<16x32xf32>
    %214 = vector.broadcast %193 : vector<1x32xf32> to vector<16x32xf32>
    %215 = arith.addf %213, %214 : vector<16x32xf32>
    %c1 = arith.constant 1 : index
    %c0_87 = arith.constant 0 : index
    %c0_88 = arith.constant 0 : index
    %216 = vector.load %arg5[%c1, %c0_87, %c0_88] : memref<2x32x96xbf16, #tpu.memory_space<vmem>>, vector<1x32x96xbf16>
    %217 = vector.shape_cast %216 : vector<1x32x96xbf16> to vector<32x96xbf16>
    %218 = arith.truncf %215 : vector<16x32xf32> to vector<16x32xbf16>
    %cst_89 = arith.constant dense<0.000000e+00> : vector<16x96xf32>
    %219 = tpu.matmul %218, %217, %cst_89 {dimension_numbers = #tpu.dot_dimension_numbers<[1], [0], [0], [1], [0, 0, 1, 1], [], []>} : vector<16x32xbf16>, vector<32x96xbf16>, vector<16x96xf32> -> vector<16x96xf32>
    %c1_90 = arith.constant 1 : index
    %c0_91 = arith.constant 0 : index
    %c0_92 = arith.constant 0 : index
    %220 = vector.load %arg6[%c1_90, %c0_91, %c0_92] : memref<2x1x96xf32, #tpu.memory_space<vmem>>, vector<1x1x96xf32>
    %221 = vector.shape_cast %220 : vector<1x1x96xf32> to vector<1x96xf32>
    %222 = vector.broadcast %221 : vector<1x96xf32> to vector<16x96xf32>
    %223 = arith.addf %219, %222 : vector<16x96xf32>
    %224 = vector.extract_strided_slice %223 {offsets = [0, 0], sizes = [16, 8], strides = [1, 1]} : vector<16x96xf32> to vector<16x8xf32>
    %225 = vector.extract_strided_slice %223 {offsets = [0, 32], sizes = [16, 8], strides = [1, 1]} : vector<16x96xf32> to vector<16x8xf32>
    %226 = vector.extract_strided_slice %223 {offsets = [0, 64], sizes = [16, 8], strides = [1, 1]} : vector<16x96xf32> to vector<16x8xf32>
    %227 = arith.truncf %224 : vector<16x8xf32> to vector<16x8xbf16>
    %228 = arith.truncf %225 : vector<16x8xf32> to vector<16x8xbf16>
    %cst_93 = arith.constant dense<0.000000e+00> : vector<16x16xf32>
    %229 = tpu.matmul %227, %228, %cst_93 {dimension_numbers = #tpu.dot_dimension_numbers<[1], [1], [0], [0], [0, 0, 1, 0], [], []>} : vector<16x8xbf16>, vector<16x8xbf16>, vector<16x16xf32> -> vector<16x16xf32>
    %cst_94 = arith.constant 0.353553385 : f32
    %230 = vector.broadcast %cst_94 : f32 to vector<16x16xf32>
    %231 = arith.mulf %229, %230 : vector<16x16xf32>
    %232 = arith.addf %231, %27 : vector<16x16xf32>
    %cst_95 = arith.constant dense<0xFF800000> : vector<16xf32>
    %233 = vector.multi_reduction <maximumf>, %232, %cst_95 [1] : vector<16x16xf32> to vector<16xf32>
    %234 = vector.shape_cast %233 : vector<16xf32> to vector<16x1xf32>
    %235 = vector.broadcast %234 : vector<16x1xf32> to vector<16x16xf32>
    %236 = arith.subf %232, %235 : vector<16x16xf32>
    %237 = math.exp %236 : vector<16x16xf32>
    %cst_96 = arith.constant dense<0.000000e+00> : vector<16xf32>
    %238 = vector.multi_reduction <add>, %237, %cst_96 [1] : vector<16x16xf32> to vector<16xf32>
    %239 = vector.shape_cast %238 : vector<16xf32> to vector<16x1xf32>
    %240 = tpu.reciprocal %239 : vector<16x1xf32> -> vector<16x1xf32>
    %241 = vector.broadcast %240 : vector<16x1xf32> to vector<16x16xf32>
    %242 = arith.mulf %237, %241 : vector<16x16xf32>
    %243 = arith.truncf %242 : vector<16x16xf32> to vector<16x16xbf16>
    %244 = arith.truncf %226 : vector<16x8xf32> to vector<16x8xbf16>
    %cst_97 = arith.constant dense<0.000000e+00> : vector<16x8xf32>
    %245 = tpu.matmul %243, %244, %cst_97 {dimension_numbers = #tpu.dot_dimension_numbers<[1], [0], [0], [1], [0, 0, 1, 1], [], []>} : vector<16x16xbf16>, vector<16x8xbf16>, vector<16x8xf32> -> vector<16x8xf32>
    %246 = vector.extract_strided_slice %223 {offsets = [0, 8], sizes = [16, 8], strides = [1, 1]} : vector<16x96xf32> to vector<16x8xf32>
    %247 = vector.extract_strided_slice %223 {offsets = [0, 40], sizes = [16, 8], strides = [1, 1]} : vector<16x96xf32> to vector<16x8xf32>
    %248 = vector.extract_strided_slice %223 {offsets = [0, 72], sizes = [16, 8], strides = [1, 1]} : vector<16x96xf32> to vector<16x8xf32>
    %249 = arith.truncf %246 : vector<16x8xf32> to vector<16x8xbf16>
    %250 = arith.truncf %247 : vector<16x8xf32> to vector<16x8xbf16>
    %cst_98 = arith.constant dense<0.000000e+00> : vector<16x16xf32>
    %251 = tpu.matmul %249, %250, %cst_98 {dimension_numbers = #tpu.dot_dimension_numbers<[1], [1], [0], [0], [0, 0, 1, 0], [], []>} : vector<16x8xbf16>, vector<16x8xbf16>, vector<16x16xf32> -> vector<16x16xf32>
    %cst_99 = arith.constant 0.353553385 : f32
    %252 = vector.broadcast %cst_99 : f32 to vector<16x16xf32>
    %253 = arith.mulf %251, %252 : vector<16x16xf32>
    %254 = arith.addf %253, %27 : vector<16x16xf32>
    %cst_100 = arith.constant dense<0xFF800000> : vector<16xf32>
    %255 = vector.multi_reduction <maximumf>, %254, %cst_100 [1] : vector<16x16xf32> to vector<16xf32>
    %256 = vector.shape_cast %255 : vector<16xf32> to vector<16x1xf32>
    %257 = vector.broadcast %256 : vector<16x1xf32> to vector<16x16xf32>
    %258 = arith.subf %254, %257 : vector<16x16xf32>
    %259 = math.exp %258 : vector<16x16xf32>
    %cst_101 = arith.constant dense<0.000000e+00> : vector<16xf32>
    %260 = vector.multi_reduction <add>, %259, %cst_101 [1] : vector<16x16xf32> to vector<16xf32>
    %261 = vector.shape_cast %260 : vector<16xf32> to vector<16x1xf32>
    %262 = tpu.reciprocal %261 : vector<16x1xf32> -> vector<16x1xf32>
    %263 = vector.broadcast %262 : vector<16x1xf32> to vector<16x16xf32>
    %264 = arith.mulf %259, %263 : vector<16x16xf32>
    %265 = arith.truncf %264 : vector<16x16xf32> to vector<16x16xbf16>
    %266 = arith.truncf %248 : vector<16x8xf32> to vector<16x8xbf16>
    %cst_102 = arith.constant dense<0.000000e+00> : vector<16x8xf32>
    %267 = tpu.matmul %265, %266, %cst_102 {dimension_numbers = #tpu.dot_dimension_numbers<[1], [0], [0], [1], [0, 0, 1, 1], [], []>} : vector<16x16xbf16>, vector<16x8xbf16>, vector<16x8xf32> -> vector<16x8xf32>
    %268 = vector.extract_strided_slice %223 {offsets = [0, 16], sizes = [16, 8], strides = [1, 1]} : vector<16x96xf32> to vector<16x8xf32>
    %269 = vector.extract_strided_slice %223 {offsets = [0, 48], sizes = [16, 8], strides = [1, 1]} : vector<16x96xf32> to vector<16x8xf32>
    %270 = vector.extract_strided_slice %223 {offsets = [0, 80], sizes = [16, 8], strides = [1, 1]} : vector<16x96xf32> to vector<16x8xf32>
    %271 = arith.truncf %268 : vector<16x8xf32> to vector<16x8xbf16>
    %272 = arith.truncf %269 : vector<16x8xf32> to vector<16x8xbf16>
    %cst_103 = arith.constant dense<0.000000e+00> : vector<16x16xf32>
    %273 = tpu.matmul %271, %272, %cst_103 {dimension_numbers = #tpu.dot_dimension_numbers<[1], [1], [0], [0], [0, 0, 1, 0], [], []>} : vector<16x8xbf16>, vector<16x8xbf16>, vector<16x16xf32> -> vector<16x16xf32>
    %cst_104 = arith.constant 0.353553385 : f32
    %274 = vector.broadcast %cst_104 : f32 to vector<16x16xf32>
    %275 = arith.mulf %273, %274 : vector<16x16xf32>
    %276 = arith.addf %275, %27 : vector<16x16xf32>
    %cst_105 = arith.constant dense<0xFF800000> : vector<16xf32>
    %277 = vector.multi_reduction <maximumf>, %276, %cst_105 [1] : vector<16x16xf32> to vector<16xf32>
    %278 = vector.shape_cast %277 : vector<16xf32> to vector<16x1xf32>
    %279 = vector.broadcast %278 : vector<16x1xf32> to vector<16x16xf32>
    %280 = arith.subf %276, %279 : vector<16x16xf32>
    %281 = math.exp %280 : vector<16x16xf32>
    %cst_106 = arith.constant dense<0.000000e+00> : vector<16xf32>
    %282 = vector.multi_reduction <add>, %281, %cst_106 [1] : vector<16x16xf32> to vector<16xf32>
    %283 = vector.shape_cast %282 : vector<16xf32> to vector<16x1xf32>
    %284 = tpu.reciprocal %283 : vector<16x1xf32> -> vector<16x1xf32>
    %285 = vector.broadcast %284 : vector<16x1xf32> to vector<16x16xf32>
    %286 = arith.mulf %281, %285 : vector<16x16xf32>
    %287 = arith.truncf %286 : vector<16x16xf32> to vector<16x16xbf16>
    %288 = arith.truncf %270 : vector<16x8xf32> to vector<16x8xbf16>
    %cst_107 = arith.constant dense<0.000000e+00> : vector<16x8xf32>
    %289 = tpu.matmul %287, %288, %cst_107 {dimension_numbers = #tpu.dot_dimension_numbers<[1], [0], [0], [1], [0, 0, 1, 1], [], []>} : vector<16x16xbf16>, vector<16x8xbf16>, vector<16x8xf32> -> vector<16x8xf32>
    %290 = vector.extract_strided_slice %223 {offsets = [0, 24], sizes = [16, 8], strides = [1, 1]} : vector<16x96xf32> to vector<16x8xf32>
    %291 = vector.extract_strided_slice %223 {offsets = [0, 56], sizes = [16, 8], strides = [1, 1]} : vector<16x96xf32> to vector<16x8xf32>
    %292 = vector.extract_strided_slice %223 {offsets = [0, 88], sizes = [16, 8], strides = [1, 1]} : vector<16x96xf32> to vector<16x8xf32>
    %293 = arith.truncf %290 : vector<16x8xf32> to vector<16x8xbf16>
    %294 = arith.truncf %291 : vector<16x8xf32> to vector<16x8xbf16>
    %cst_108 = arith.constant dense<0.000000e+00> : vector<16x16xf32>
    %295 = tpu.matmul %293, %294, %cst_108 {dimension_numbers = #tpu.dot_dimension_numbers<[1], [1], [0], [0], [0, 0, 1, 0], [], []>} : vector<16x8xbf16>, vector<16x8xbf16>, vector<16x16xf32> -> vector<16x16xf32>
    %cst_109 = arith.constant 0.353553385 : f32
    %296 = vector.broadcast %cst_109 : f32 to vector<16x16xf32>
    %297 = arith.mulf %295, %296 : vector<16x16xf32>
    %298 = arith.addf %297, %27 : vector<16x16xf32>
    %cst_110 = arith.constant dense<0xFF800000> : vector<16xf32>
    %299 = vector.multi_reduction <maximumf>, %298, %cst_110 [1] : vector<16x16xf32> to vector<16xf32>
    %300 = vector.shape_cast %299 : vector<16xf32> to vector<16x1xf32>
    %301 = vector.broadcast %300 : vector<16x1xf32> to vector<16x16xf32>
    %302 = arith.subf %298, %301 : vector<16x16xf32>
    %303 = math.exp %302 : vector<16x16xf32>
    %cst_111 = arith.constant dense<0.000000e+00> : vector<16xf32>
    %304 = vector.multi_reduction <add>, %303, %cst_111 [1] : vector<16x16xf32> to vector<16xf32>
    %305 = vector.shape_cast %304 : vector<16xf32> to vector<16x1xf32>
    %306 = tpu.reciprocal %305 : vector<16x1xf32> -> vector<16x1xf32>
    %307 = vector.broadcast %306 : vector<16x1xf32> to vector<16x16xf32>
    %308 = arith.mulf %303, %307 : vector<16x16xf32>
    %309 = arith.truncf %308 : vector<16x16xf32> to vector<16x16xbf16>
    %310 = arith.truncf %292 : vector<16x8xf32> to vector<16x8xbf16>
    %cst_112 = arith.constant dense<0.000000e+00> : vector<16x8xf32>
    %311 = tpu.matmul %309, %310, %cst_112 {dimension_numbers = #tpu.dot_dimension_numbers<[1], [0], [0], [1], [0, 0, 1, 1], [], []>} : vector<16x16xbf16>, vector<16x8xbf16>, vector<16x8xf32> -> vector<16x8xf32>
    %312 = tpu.concatenate %245, %267, %289, %311 in 1 : vector<16x8xf32>, vector<16x8xf32>, vector<16x8xf32>, vector<16x8xf32> -> vector<16x32xf32>
    %c1_113 = arith.constant 1 : index
    %c0_114 = arith.constant 0 : index
    %c0_115 = arith.constant 0 : index
    %313 = vector.load %arg7[%c1_113, %c0_114, %c0_115] : memref<2x32x32xbf16, #tpu.memory_space<vmem>>, vector<1x32x32xbf16>
    %314 = vector.shape_cast %313 : vector<1x32x32xbf16> to vector<32x32xbf16>
    %315 = arith.truncf %312 : vector<16x32xf32> to vector<16x32xbf16>
    %cst_116 = arith.constant dense<0.000000e+00> : vector<16x32xf32>
    %316 = tpu.matmul %315, %314, %cst_116 {dimension_numbers = #tpu.dot_dimension_numbers<[1], [0], [0], [1], [0, 0, 1, 1], [], []>} : vector<16x32xbf16>, vector<32x32xbf16>, vector<16x32xf32> -> vector<16x32xf32>
    %c1_117 = arith.constant 1 : index
    %c0_118 = arith.constant 0 : index
    %c0_119 = arith.constant 0 : index
    %317 = vector.load %arg8[%c1_117, %c0_118, %c0_119] : memref<2x1x32xf32, #tpu.memory_space<vmem>>, vector<1x1x32xf32>
    %318 = vector.shape_cast %317 : vector<1x1x32xf32> to vector<1x32xf32>
    %319 = vector.broadcast %318 : vector<1x32xf32> to vector<16x32xf32>
    %320 = arith.addf %316, %319 : vector<16x32xf32>
    %321 = arith.addf %320, %215 : vector<16x32xf32>
    %c1_120 = arith.constant 1 : index
    %c0_121 = arith.constant 0 : index
    %c0_122 = arith.constant 0 : index
    %322 = vector.load %arg9[%c1_120, %c0_121, %c0_122] : memref<2x1x32xf32, #tpu.memory_space<vmem>>, vector<1x1x32xf32>
    %323 = vector.shape_cast %322 : vector<1x1x32xf32> to vector<1x32xf32>
    %c1_123 = arith.constant 1 : index
    %c0_124 = arith.constant 0 : index
    %c0_125 = arith.constant 0 : index
    %324 = vector.load %arg10[%c1_123, %c0_124, %c0_125] : memref<2x1x32xf32, #tpu.memory_space<vmem>>, vector<1x1x32xf32>
    %325 = vector.shape_cast %324 : vector<1x1x32xf32> to vector<1x32xf32>
    %cst_126 = arith.constant dense<0.000000e+00> : vector<16xf32>
    %326 = vector.multi_reduction <add>, %321, %cst_126 [1] : vector<16x32xf32> to vector<16xf32>
    %327 = vector.shape_cast %326 : vector<16xf32> to vector<16x1xf32>
    %cst_127 = arith.constant 3.200000e+01 : f32
    %328 = vector.broadcast %cst_127 : f32 to vector<16x1xf32>
    %329 = arith.divf %327, %328 : vector<16x1xf32>
    %330 = vector.broadcast %329 : vector<16x1xf32> to vector<16x32xf32>
    %331 = arith.subf %321, %330 : vector<16x32xf32>
    %332 = arith.mulf %331, %331 : vector<16x32xf32>
    %cst_128 = arith.constant dense<0.000000e+00> : vector<16xf32>
    %333 = vector.multi_reduction <add>, %332, %cst_128 [1] : vector<16x32xf32> to vector<16xf32>
    %334 = vector.shape_cast %333 : vector<16xf32> to vector<16x1xf32>
    %cst_129 = arith.constant 3.200000e+01 : f32
    %335 = vector.broadcast %cst_129 : f32 to vector<16x1xf32>
    %336 = arith.divf %334, %335 : vector<16x1xf32>
    %337 = vector.broadcast %329 : vector<16x1xf32> to vector<16x32xf32>
    %338 = arith.subf %321, %337 : vector<16x32xf32>
    %cst_130 = arith.constant 9.99999996E-13 : f32
    %339 = vector.broadcast %cst_130 : f32 to vector<16x1xf32>
    %340 = arith.addf %336, %339 : vector<16x1xf32>
    %341 = math.rsqrt %340 : vector<16x1xf32>
    %342 = vector.broadcast %341 : vector<16x1xf32> to vector<16x32xf32>
    %343 = arith.mulf %338, %342 : vector<16x32xf32>
    %344 = vector.broadcast %323 : vector<1x32xf32> to vector<16x32xf32>
    %345 = arith.mulf %343, %344 : vector<16x32xf32>
    %346 = vector.broadcast %325 : vector<1x32xf32> to vector<16x32xf32>
    %347 = arith.addf %345, %346 : vector<16x32xf32>
    %c1_131 = arith.constant 1 : index
    %c0_132 = arith.constant 0 : index
    %c0_133 = arith.constant 0 : index
    %348 = vector.load %arg11[%c1_131, %c0_132, %c0_133] : memref<2x32x64xbf16, #tpu.memory_space<vmem>>, vector<1x32x64xbf16>
    %349 = vector.shape_cast %348 : vector<1x32x64xbf16> to vector<32x64xbf16>
    %350 = arith.truncf %347 : vector<16x32xf32> to vector<16x32xbf16>
    %cst_134 = arith.constant dense<0.000000e+00> : vector<16x64xf32>
    %351 = tpu.matmul %350, %349, %cst_134 {dimension_numbers = #tpu.dot_dimension_numbers<[1], [0], [0], [1], [0, 0, 1, 1], [], []>} : vector<16x32xbf16>, vector<32x64xbf16>, vector<16x64xf32> -> vector<16x64xf32>
    %c1_135 = arith.constant 1 : index
    %c0_136 = arith.constant 0 : index
    %c0_137 = arith.constant 0 : index
    %352 = vector.load %arg12[%c1_135, %c0_136, %c0_137] : memref<2x1x64xf32, #tpu.memory_space<vmem>>, vector<1x1x64xf32>
    %353 = vector.shape_cast %352 : vector<1x1x64xf32> to vector<1x64xf32>
    %354 = vector.broadcast %353 : vector<1x64xf32> to vector<16x64xf32>
    %355 = arith.addf %351, %354 : vector<16x64xf32>
    %356 = arith.mulf %355, %355 : vector<16x64xf32>
    %357 = arith.mulf %355, %356 : vector<16x64xf32>
    %cst_138 = arith.constant 4.471500e-02 : f32
    %358 = vector.broadcast %cst_138 : f32 to vector<16x64xf32>
    %359 = arith.mulf %358, %357 : vector<16x64xf32>
    %360 = arith.addf %355, %359 : vector<16x64xf32>
    %cst_139 = arith.constant 0.797884583 : f32
    %361 = vector.broadcast %cst_139 : f32 to vector<16x64xf32>
    %362 = arith.mulf %361, %360 : vector<16x64xf32>
    %363 = math.tanh %362 : vector<16x64xf32>
    %cst_140 = arith.constant 1.000000e+00 : f32
    %364 = vector.broadcast %cst_140 : f32 to vector<16x64xf32>
    %365 = arith.addf %364, %363 : vector<16x64xf32>
    %cst_141 = arith.constant 5.000000e-01 : f32
    %366 = vector.broadcast %cst_141 : f32 to vector<16x64xf32>
    %367 = arith.mulf %366, %365 : vector<16x64xf32>
    %368 = arith.mulf %355, %367 : vector<16x64xf32>
    %c1_142 = arith.constant 1 : index
    %c0_143 = arith.constant 0 : index
    %c0_144 = arith.constant 0 : index
    %369 = vector.load %arg13[%c1_142, %c0_143, %c0_144] : memref<2x64x32xbf16, #tpu.memory_space<vmem>>, vector<1x64x32xbf16>
    %370 = vector.shape_cast %369 : vector<1x64x32xbf16> to vector<64x32xbf16>
    %371 = arith.truncf %368 : vector<16x64xf32> to vector<16x64xbf16>
    %cst_145 = arith.constant dense<0.000000e+00> : vector<16x32xf32>
    %372 = tpu.matmul %371, %370, %cst_145 {dimension_numbers = #tpu.dot_dimension_numbers<[1], [0], [0], [1], [0, 0, 1, 1], [], []>} : vector<16x64xbf16>, vector<64x32xbf16>, vector<16x32xf32> -> vector<16x32xf32>
    %c1_146 = arith.constant 1 : index
    %c0_147 = arith.constant 0 : index
    %c0_148 = arith.constant 0 : index
    %373 = vector.load %arg14[%c1_146, %c0_147, %c0_148] : memref<2x1x32xf32, #tpu.memory_space<vmem>>, vector<1x1x32xf32>
    %374 = vector.shape_cast %373 : vector<1x1x32xf32> to vector<1x32xf32>
    %375 = vector.broadcast %374 : vector<1x32xf32> to vector<16x32xf32>
    %376 = arith.addf %372, %375 : vector<16x32xf32>
    %377 = arith.addf %376, %347 : vector<16x32xf32>
    %c1_149 = arith.constant 1 : index
    %c0_150 = arith.constant 0 : index
    %c0_151 = arith.constant 0 : index
    %378 = vector.load %arg15[%c1_149, %c0_150, %c0_151] : memref<2x1x32xf32, #tpu.memory_space<vmem>>, vector<1x1x32xf32>
    %379 = vector.shape_cast %378 : vector<1x1x32xf32> to vector<1x32xf32>
    %c1_152 = arith.constant 1 : index
    %c0_153 = arith.constant 0 : index
    %c0_154 = arith.constant 0 : index
    %380 = vector.load %arg16[%c1_152, %c0_153, %c0_154] : memref<2x1x32xf32, #tpu.memory_space<vmem>>, vector<1x1x32xf32>
    %381 = vector.shape_cast %380 : vector<1x1x32xf32> to vector<1x32xf32>
    %cst_155 = arith.constant dense<0.000000e+00> : vector<16xf32>
    %382 = vector.multi_reduction <add>, %377, %cst_155 [1] : vector<16x32xf32> to vector<16xf32>
    %383 = vector.shape_cast %382 : vector<16xf32> to vector<16x1xf32>
    %cst_156 = arith.constant 3.200000e+01 : f32
    %384 = vector.broadcast %cst_156 : f32 to vector<16x1xf32>
    %385 = arith.divf %383, %384 : vector<16x1xf32>
    %386 = vector.broadcast %385 : vector<16x1xf32> to vector<16x32xf32>
    %387 = arith.subf %377, %386 : vector<16x32xf32>
    %388 = arith.mulf %387, %387 : vector<16x32xf32>
    %cst_157 = arith.constant dense<0.000000e+00> : vector<16xf32>
    %389 = vector.multi_reduction <add>, %388, %cst_157 [1] : vector<16x32xf32> to vector<16xf32>
    %390 = vector.shape_cast %389 : vector<16xf32> to vector<16x1xf32>
    %cst_158 = arith.constant 3.200000e+01 : f32
    %391 = vector.broadcast %cst_158 : f32 to vector<16x1xf32>
    %392 = arith.divf %390, %391 : vector<16x1xf32>
    %393 = vector.broadcast %385 : vector<16x1xf32> to vector<16x32xf32>
    %394 = arith.subf %377, %393 : vector<16x32xf32>
    %cst_159 = arith.constant 9.99999996E-13 : f32
    %395 = vector.broadcast %cst_159 : f32 to vector<16x1xf32>
    %396 = arith.addf %392, %395 : vector<16x1xf32>
    %397 = math.rsqrt %396 : vector<16x1xf32>
    %398 = vector.broadcast %397 : vector<16x1xf32> to vector<16x32xf32>
    %399 = arith.mulf %394, %398 : vector<16x32xf32>
    %400 = vector.broadcast %379 : vector<1x32xf32> to vector<16x32xf32>
    %401 = arith.mulf %399, %400 : vector<16x32xf32>
    %402 = vector.broadcast %381 : vector<1x32xf32> to vector<16x32xf32>
    %403 = arith.addf %401, %402 : vector<16x32xf32>
    %404 = vector.extract_strided_slice %403 {offsets = [0, 0], sizes = [1, 32], strides = [1, 1]} : vector<16x32xf32> to vector<1x32xf32>
    %405 = vector.extract_strided_slice %403 {offsets = [8, 0], sizes = [1, 32], strides = [1, 1]} : vector<16x32xf32> to vector<1x32xf32>
    %406 = tpu.concatenate %404, %405 in 0 : vector<1x32xf32>, vector<1x32xf32> -> vector<2x32xf32>
    %c0_160 = arith.constant 0 : index
    %c0_161 = arith.constant 0 : index
    %c0_162 = arith.constant 0 : index
    %407 = vector.load %arg17[%c0_160, %c0_161, %c0_162] : memref<1x2x32xf32, #tpu.memory_space<vmem>>, vector<1x2x32xf32>
    %408 = vector.shape_cast %407 : vector<1x2x32xf32> to vector<2x32xf32>
    %409 = vector.shape_cast %406 : vector<2x32xf32> to vector<1x2x32xf32>
    tpu.vector_store %arg17[%c0_160, %c0_161, %c0_162], %409 {strides = array<i32>} : memref<1x2x32xf32, #tpu.memory_space<vmem>>, vector<1x2x32xf32>,
    return
  }
  func.func @transform_0(%arg0: i32) -> (i32, i32) {
    %c0_i32 = arith.constant 0 : i32
    %c0_i32_0 = arith.constant 0 : i32
    return %arg0, %c0_i32 : i32, i32
  }
  func.func @transform_1(%arg0: i32) -> (i32, i32) {
    %c0_i32 = arith.constant 0 : i32
    %c0_i32_0 = arith.constant 0 : i32
    return %arg0, %c0_i32 : i32, i32
  }
  func.func @transform_2(%arg0: i32) -> (i32, i32, i32) {
    %c0_i32 = arith.constant 0 : i32
    %c0_i32_0 = arith.constant 0 : i32
    %c0_i32_1 = arith.constant 0 : i32
    return %arg0, %c0_i32, %c0_i32_0 : i32, i32, i32
  }
  func.func @transform_3(%arg0: i32) -> (i32, i32, i32) {
    %c0_i32 = arith.constant 0 : i32
    %c0_i32_0 = arith.constant 0 : i32
    %c0_i32_1 = arith.constant 0 : i32
    return %arg0, %c0_i32, %c0_i32_0 : i32, i32, i32
  }
  func.func @transform_4(%arg0: i32) -> (i32, i32, i32) {
    %c0_i32 = arith.constant 0 : i32
    %c0_i32_0 = arith.constant 0 : i32
    %c0_i32_1 = arith.constant 0 : i32
    return %arg0, %c0_i32, %c0_i32_0 : i32, i32, i32
  }
  func.func @transform_5(%arg0: i32) -> (i32, i32, i32) {
    %c0_i32 = arith.constant 0 : i32
    %c0_i32_0 = arith.constant 0 : i32
    %c0_i32_1 = arith.constant 0 : i32
    return %arg0, %c0_i32, %c0_i32_0 : i32, i32, i32
  }
  func.func @transform_6(%arg0: i32) -> (i32, i32, i32) {
    %c0_i32 = arith.constant 0 : i32
    %c0_i32_0 = arith.constant 0 : i32
    %c0_i32_1 = arith.constant 0 : i32
    return %arg0, %c0_i32, %c0_i32_0 : i32, i32, i32
  }
  func.func @transform_7(%arg0: i32) -> (i32, i32, i32) {
    %c0_i32 = arith.constant 0 : i32
    %c0_i32_0 = arith.constant 0 : i32
    %c0_i32_1 = arith.constant 0 : i32
    return %arg0, %c0_i32, %c0_i32_0 : i32, i32, i32
  }
  func.func @transform_8(%arg0: i32) -> (i32, i32, i32) {
    %c0_i32 = arith.constant 0 : i32
    %c0_i32_0 = arith.constant 0 : i32
    %c0_i32_1 = arith.constant 0 : i32
    return %arg0, %c0_i32, %c0_i32_0 : i32, i32, i32
  }
  func.func @transform_9(%arg0: i32) -> (i32, i32, i32) {
    %c0_i32 = arith.constant 0 : i32
    %c0_i32_0 = arith.constant 0 : i32
    %c0_i32_1 = arith.constant 0 : i32
    return %arg0, %c0_i32, %c0_i32_0 : i32, i32, i32
  }
  func.func @transform_10(%arg0: i32) -> (i32, i32, i32) {
    %c0_i32 = arith.constant 0 : i32
    %c0_i32_0 = arith.constant 0 : i32
    %c0_i32_1 = arith.constant 0 : i32
    return %arg0, %c0_i32, %c0_i32_0 : i32, i32, i32
  }
  func.func @transform_11(%arg0: i32) -> (i32, i32, i32) {
    %c0_i32 = arith.constant 0 : i32
    %c0_i32_0 = arith.constant 0 : i32
    %c0_i32_1 = arith.constant 0 : i32
    return %arg0, %c0_i32, %c0_i32_0 : i32, i32, i32
  }
  func.func @transform_12(%arg0: i32) -> (i32, i32, i32) {
    %c0_i32 = arith.constant 0 : i32
    %c0_i32_0 = arith.constant 0 : i32
    %c0_i32_1 = arith.constant 0 : i32
    return %arg0, %c0_i32, %c0_i32_0 : i32, i32, i32
  }
  func.func @transform_13(%arg0: i32) -> (i32, i32, i32) {
    %c0_i32 = arith.constant 0 : i32
    %c0_i32_0 = arith.constant 0 : i32
    %c0_i32_1 = arith.constant 0 : i32
    return %arg0, %c0_i32, %c0_i32_0 : i32, i32, i32
  }
  func.func @transform_14(%arg0: i32) -> (i32, i32, i32) {
    %c0_i32 = arith.constant 0 : i32
    %c0_i32_0 = arith.constant 0 : i32
    %c0_i32_1 = arith.constant 0 : i32
    return %arg0, %c0_i32, %c0_i32_0 : i32, i32, i32
  }
  func.func @transform_15(%arg0: i32) -> (i32, i32, i32) {
    %c0_i32 = arith.constant 0 : i32
    %c0_i32_0 = arith.constant 0 : i32
    %c0_i32_1 = arith.constant 0 : i32
    return %arg0, %c0_i32, %c0_i32_0 : i32, i32, i32
  }
  func.func @transform_16(%arg0: i32) -> (i32, i32, i32) {
    %c0_i32 = arith.constant 0 : i32
    %c0_i32_0 = arith.constant 0 : i32
    %c0_i32_1 = arith.constant 0 : i32
    return %arg0, %c0_i32, %c0_i32_0 : i32, i32, i32
  }
}

</mosaic_0001>

<bundles_post_ra>
// kernel: _forward_pair.1
= control target key start
LH: loop header
LB: loop body
LE: loop exit
PB: predicated region body
PF: predicated region fallthrough
CT: control target
= control target key end

     0   :  { %s3586_s21 = smov 0   ;;  %s4007_s0 = inlined_call_operand.vmem [shape: f32[32,32], index: 0, kind: input, shape index: {}]   ;;  %s4008_s1 = inlined_call_operand.vmem [shape: f32[32,16], index: 1, kind: input, shape index: {}]   ;;  %s4009_s2 = inlined_call_operand.vmem [shape: f32[2,1,32], index: 2, kind: input, shape index: {}]   ;;  %s4010_s3 = inlined_call_operand.vmem [shape: f32[2,1,32], index: 3, kind: input, shape index: {}]   ;;  %s4011_s4 = inlined_call_operand.vmem [shape: bf16[4,32,96], index: 4, kind: input, shape index: {}]   ;;  %s4012_s5 = inlined_call_operand.vmem [shape: f32[4,1,96], index: 5, kind: input, shape index: {}]   ;;  %s4013_s6 = inlined_call_operand.vmem [shape: bf16[4,32,32], index: 6, kind: input, shape index: {}]   ;;  %s4014_s7 = inlined_call_operand.vmem [shape: f32[4,1,32], index: 7, kind: input, shape index: {}]   ;;  %s4015_s8 = inlined_call_operand.vmem [shape: f32[4,1,32], index: 8, kind: input, shape index: {}]   ;;  %s4016_s9 = inlined_call_operand.vmem [shape: f32[4,1,32], index: 9, kind: input, shape index: {}]   ;;  %s4017_s10 = inlined_call_operand.vmem [shape: bf16[4,32,64], index: 10, kind: input, shape index: {}]   ;;  %s4018_s11 = inlined_call_operand.vmem [shape: f32[4,1,64], index: 11, kind: input, shape index: {}]   ;;  %s4019_s12 = inlined_call_operand.vmem [shape: bf16[4,64,32], index: 12, kind: input, shape index: {}]   ;;  %s4020_s13 = inlined_call_operand.vmem [shape: f32[4,1,32], index: 13, kind: input, shape index: {}]   ;;  %s4021_s14 = inlined_call_operand.vmem [shape: f32[4,1,32], index: 14, kind: input, shape index: {}]   ;;  %s4022_s15 = inlined_call_operand.vmem [shape: f32[4,1,32], index: 15, kind: input, shape index: {}]   ;;  %s4023_s16 = inlined_call_operand.vmem [shape: f32[2,2,32], index: 16, kind: output, shape index: {}]  }
   0x1   :  { %4038 = sst [smem:[#allocation2_spill]] %s4007_s0 }
   0x2   :  { %4039 = sst [smem:[#allocation3_spill]] %s4008_s1 }
   0x3   :  { %4040 = sst [smem:[#allocation4_spill]] %s4009_s2 }
   0x4   :  { %4041 = sst [smem:[#allocation5_spill]] %s4010_s3 }
   0x5   :  { %4042 = sst [smem:[#allocation6_spill]] %s4011_s4 }
   0x6 LB: > { %s3592_s22 = sadd.s32 4294967295, %s3483_s21   ;;  %p2961_p0 = scmp.ge.s32.totalorder %s3483_s21, 1  ;;  %s3483_s21 = sphi %s3586_s21, %s26_s21  }
   0x7   : > { %p618_p1 = scmp.lt.s32.totalorder %s3483_s21, 3 }
   0x9   : > { %p619_p2 = pnand %p2961_p0, %p618_p1 }
   0xa   : > { %s2962_s23 = sshll.u32 (!%p619_p2), %s3592_s22, 1  ;;  %s4043_s27 = sld [smem:[#allocation2_spill]] (!%p619_p2) }
   0xb   : > { %622 = sbr.rel (%p619_p2) target bundleno = 5216 (0x1460), region = 84  ;;  %p735_p3 = scmp.lt.s32.totalorder (!%p619_p2), %s2962_s23, 3 }
   0xc   : > { %s4044_s4 = sld [smem:[#allocation6_spill]] (!%p619_p2)  ;;  %p746_p4 = scmp.lt.s32.totalorder (!%p619_p2), %s3592_s22, 1 }
   0xd   : > { %s4045_s2 = sld [smem:[#allocation4_spill]] (!%p619_p2)  ;;  %s4035_s0 = smov (!%p619_p2), 120  }
   0xe   : > { %s4046_s3 = sld [smem:[#allocation5_spill]] (!%p619_p2)  ;;  %s4034_s18 = smov (!%p619_p2), 112  }
   0xf   : > { %s4025_s25 = smov (!%p619_p2), 104   ;;  %s4024_s26 = smov (!%p619_p2), 72  }
  0x10   : > { %s4063_s23 = smov (!%p735_p3, %s2962_s23), 3  ;;  %vm829_vm0 = vcmask 261120   ;;  %v3485_v14 = vmov 0.0   ;;  %vm3486_vm1 = vmmov 0   ;;  %s4065_s22 = smov (!%p746_p4, %s3592_s22), 1  ;;  %vm947_vm2 = vcmask 64512  }
  0x11   : > { %s2963_s24 = sshll.u32 %s4063_s23, 3  ;;  %s3079_s29 = sshll.u32 %s4063_s23, 4  ;;  %3143 = vmatprep.subr.bf16.mxu1 %v3485_v14  ;;  %3147 = vmatprep.mubr.msk.bf16.mxu1 %vm3486_vm1, %v3485_v14  ;;  %vm999_vm3 = vcmask 130048   ;;  %vm1473_vm4 = vcmask 195584   ;;  %vm1716_vm5 = vcmask 523264   ;;  %vm2750_vm6 = vcmask 1040384  }
  0x12   : > { %s738_s28 = scalar_lea.vmem %s4043_s27, %s2963_s24  ;;  %s3614_s17 = scalar_lea.vmem %s4044_s4, %s3079_s29  ;;  %3157 = vmatprep.subr.bf16.mxu0 %v3485_v14  ;;  %3159 = vmatprep.mubr.msk.bf16.mxu0 %vm3486_vm1, %v3485_v14  ;;  %vm2752_vm7 = vcmask 254976  }
  0x13   : > { %v825_v0 = vld [vmem:[%s738_s28] sm:$0xff]  ;;  %v826_v2 = vld [vmem:[%s738_s28 + $0x8] sm:$0xff]  ;;  %s3625_s20 = scalar_lea.vmem %s4013_s6, %s3079_s29  ;;  %s3631_s27 = scalar_lea.vmem %s4017_s10, %s3079_s29 }
  0x14   : > { %v830_v1 = vsel %vm829_vm0, %v825_v0, 0.0  ;;  %v833_v3 = vsel %vm829_vm0, %v826_v2, 0.0  ;;  %v3365_v15 = vld [vmem:[%s3614_s17 + $0x8] sm:$0xff]   ;;  %v3366_v16 = vld [vmem:[%s3614_s17] sm:$0xff]   ;;  %s748_s30 = scalar_lea.vmem %s4045_s2, %s4065_s22  ;;  %s751_s19 = scalar_lea.vmem %s4046_s3, %s4065_s22 }
  0x15   : > { %831 = vadd.xlane.f32.xlu0 %v830_v1  ;;  %3144 = vmatpush3.bf16.msra.mxu1 %v3365_v15  ;;  %v2987_v25 = vld [vmem:[%s748_s30] ss:$0 sm:$0xff]  ;;  %s3660_s28 = scalar_lea.vmem %s4012_s5, %s4063_s23  ;;  %s4037_s29 = smov 88  }
  0x16   : > { %3145 = vmatprep.subr.bf16.mxu1 %v3485_v14  ;;  %v2988_v29 = vld [vmem:[%s751_s19] ss:$0 sm:$0xff]  ;;  %s4036_s30 = smov 96   ;;  %s4026_s19 = smov 80  }
  0x17   : > { %v2989_v35 = vld [vmem:[%s3660_s28] ss:$0 sm:$0xff]  ;;  %s4047_s1 = sld [smem:[#allocation3_spill]]  ;;  %s3857_s3 = scalar_lea.vmem %s4022_s15, %s4063_s23 }
  0x18   : > { %s4048_s2 = smov 88   ;;  %s4054_s4 = smov 72  }
  0x19   : > { %834 = vadd.xlane.f32.xlu0 %v833_v3  ;;  %3146 = vmatpush3.bf16.msra.mxu1 %v3366_v16 }
  0x1a   : > { %3151 = vmatprep.subr.bf16.mxu1 %v3485_v14 }
  0x9e   : > { %v832_v4 = vpop.xlane.xlu0 %831 }
  0x9f   : > { %v837_v5 = vmul.f32 0.03125, %v832_v4 }
  0xa1   : > { %v839_v6 = vsub.f32 %v825_v0, %v837_v5 }
  0xa2   : > { %v835_v7 = vpop.xlane.xlu0 %834 }
  0xa3   : > { %v838_v8 = vmul.f32 0.03125, %v835_v7  ;;  %v841_v9 = vmul.f32 %v839_v6, %v839_v6 }
  0xa5   : > { %v840_v10 = vsub.f32 %v826_v2, %v838_v8  ;;  %v843_v11 = vsel %vm829_vm0, %v841_v9, 0.0 }
  0xa6   : > { %844 = vadd.xlane.f32.xlu1 %v843_v11 }
  0xa7   : > { %v842_v12 = vmul.f32 %v840_v10, %v840_v10 }
  0xa9   : > { %v846_v13 = vsel %vm829_vm0, %v842_v12, 0.0 }
  0xaa   : > { %847 = vadd.xlane.f32.xlu1 %v846_v13 }
 0x12f   : > { %v845_v17 = vpop.xlane.xlu1 %844 }
 0x130   : > { %v849_v18 = vmul.f32 0.03125, %v845_v17 }
 0x132   : > { %v851_v19 = vadd.f32 1e-12, %v849_v18 }
 0x133   : > { %v848_v20 = vpop.xlane.xlu1 %847 }
 0x134   : > { %3385 = vrsqrt.f32 %v851_v19  ;;  %v850_v21 = vmul.f32 0.03125, %v848_v20 }
 0x136   : > { %v852_v22 = vadd.f32 1e-12, %v850_v21 }
 0x138   : > { %3387 = vrsqrt.f32 %v852_v22 }
 0x141   : > { %v3386_v23 = vpop.eup %3385 }
 0x142   : > { %v855_v24 = vmul.f32 %v3386_v23, %v839_v6 }
 0x144   : > { %v863_v28 = vmul.f32 %v2987_v25, %v855_v24 }
 0x145   : > { %v3388_v26 = vpop.eup %3387 }
 0x146   : > { %v856_v27 = vmul.f32 %v3388_v26, %v840_v10  ;;  %v3647_v31 = vadd.f32 %v2988_v29, %v863_v28 }
 0x148   : > { %v864_v30 = vmul.f32 %v2987_v25, %v856_v27 }
 0x14a   : > { %v3649_v32 = vadd.f32 %v2988_v29, %v864_v30 }
 0x14c   : > { %v879_v33 = vpack.c.bf16 %v3649_v32, %v3647_v31 }
 0x14e   : > { %3148 = vmatmul.mubr.msk.bf16.vlgmr.msra.gmra.mxu1 %vm829_vm0, %v879_v33 }
 0x14f   : > { %3153 = vmatprep.mubr.msk.bf16.mxu1 %vm3486_vm1, %v3485_v14 }
 0x20e   : > { %v936_v34 = vpop.f32.mrf.mxu1 }
 0x20f   : > { %v937_v38 = vadd.f32 %v2989_v35, %v936_v34 }
 0x210   : > { %v3149_v36 = vpop.f32.mrf.mxu1 }
 0x212   : > { %v939_v37 = vpop.f32.mrf.mxu1 }
 0x213   : > { %v940_v39 = vadd.f32 %v2989_v35, %v939_v37 }
 0x214   : > { %v3150_v40 = vpop.f32.mrf.mxu1 }
 0x215   : > { %v3663_v41 = vpack.c.bf16 %v940_v39, %v937_v38 }
 0x217   : > { %1072 = vrot.lane.b32.xlu1 %v3663_v41, %s4037_s29  ;;  %945 = vrot.lane.b32.xlu0 %v3663_v41, %s4036_s30  ;;  %s3801_s30 = scalar_lea.vmem %s4016_s9, %s4063_s23  ;;  %s3835_s29 = scalar_lea.vmem %s4020_s13, %s4063_s23 }
 0x21b   : > { %1070 = vrot.lane.b32.xlu1 %v3663_v41, %s4035_s0  ;;  %1195 = vrot.lane.b32.xlu0 %v3663_v41, %s4034_s18  ;;  %s3825_s0 = scalar_lea.vmem %s4018_s11, %s4063_s23 }
 0x21f   : > { %1197 = vrot.lane.b32.xlu1 %v3663_v41, %s4026_s19  ;;  %1320 = vrot.lane.b32.xlu0 %v3663_v41, %s4025_s25  ;;  %s744_s19 = scalar_lea.vmem %s4047_s1, %s2963_s24  ;;  %s4033_s24 = smov 64  }
 0x220   : > { %v3705_v53 = vld [vmem:[%s744_s19] sm:$0xff]  ;;  %v3708_v58 = vld [vmem:[%s744_s19 + $0x8] sm:$0xff]  ;;  %s4032_s19 = smov 48   ;;  %s4028_s25 = smov 40  }
 0x221   : > { %s3850_s1 = scalar_lea.vmem %s4021_s14, %s4063_s23 }
 0x223   : > { %1322 = vrot.lane.b32.xlu1 %v3663_v41, %s4024_s26  ;;  %s4027_s26 = smov 56  }
 0x289   : > { %v946_v42 = vpop.permute.xlu0 %945  ;;  %v1073_v44 = vpop.permute.xlu1 %1072 }
 0x28a   : > { %v952_v43 = vsel %vm947_vm2, %v946_v42, 0  ;;  %v1078_v46 = vsel %vm947_vm2, %v1073_v44, 0 }
 0x28b   : > { %3152 = vmatpush3.bf16.xpose.msra.mxu1 %v952_v43 }
 0x28c   : > { %3163 = vmatprep.subr.bf16.mxu1 %v3485_v14 }
 0x28d   : > { %v1071_v45 = vpop.permute.xlu1 %1070  ;;  %v1196_v50 = vpop.permute.xlu0 %1195 }
 0x291   : > { %v1198_v47 = vpop.permute.xlu1 %1197  ;;  %v1321_v52 = vpop.permute.xlu0 %1320 }
 0x292   : > { %3154 = vmatmul.mubr.msk.bf16.vlgmr.msra.gmra.mxu1 %vm947_vm2, %v3663_v41  ;;  %v1203_v48 = vsel %vm947_vm2, %v1198_v47, 0 }
 0x293   : > { %3164 = vmatpush3.bf16.xpose.msra.mxu1 %v1078_v46  ;;  %3165 = vmatprep.mubr.msk.bf16.mxu1 %vm3486_vm1, %v3485_v14 }
 0x294   : > { %3175 = vmatprep.subr.bf16.mxu1 %v3485_v14 }
 0x295   : > { %v1323_v49 = vpop.permute.xlu1 %1322 }
 0x296   : > { %v1328_v51 = vsel %vm947_vm2, %v1323_v49, 0 }
 0x29a   : > { %3166 = vmatmul.mubr.msk.bf16.vlgmr.msra.gmra.mxu1 %vm947_vm2, %v1071_v45 }
 0x29b   : > { %3176 = vmatpush3.bf16.xpose.msra.mxu1 %v1203_v48  ;;  %3177 = vmatprep.mubr.msk.bf16.mxu1 %vm3486_vm1, %v3485_v14 }
 0x29c   : > { %3187 = vmatprep.subr.bf16.mxu1 %v3485_v14 }
 0x2a2   : > { %3178 = vmatmul.mubr.msk.bf16.vlgmr.msra.gmra.mxu1 %vm947_vm2, %v1196_v50 }
 0x2a3   : > { %3188 = vmatpush3.bf16.xpose.msra.mxu1 %v1328_v51  ;;  %3189 = vmatprep.mubr.msk.bf16.mxu1 %vm3486_vm1, %v3485_v14 }
 0x2a4   : > { %3199 = vmatprep.subr.bf16.mxu1 %v3485_v14 }
 0x2aa   : > { %3190 = vmatmul.mubr.msk.bf16.vlgmr.msra.gmra.mxu1 %vm947_vm2, %v1321_v52 }
 0x2ab   : > { %3203 = vmatprep.mubr.msk.bf16.mxu1 %vm3486_vm1, %v3485_v14 }
 0x352   : > { %v988_v54 = vpop.f32.mrf.mxu1 }
 0x353   : > { %v995_v55 = vmul.f32 0.35355338, %v988_v54 }
 0x354   : > { %v3155_v56 = vpop.f32.mrf.mxu1 }
 0x355   : > { %v997_v57 = vadd.f32 %v995_v55, %v3705_v53 }
 0x356   : > { %v991_v59 = vpop.f32.mrf.mxu1 }
 0x357   : > { %v996_v60 = vmul.f32 0.35355338, %v991_v59  ;;  %v1000_v61 = vsel %vm999_vm3, %v997_v57, -inf }
 0x358   : > { %1001 = vmax.xlane.f32.xlu1 %v1000_v61  ;;  %v3156_v62 = vpop.f32.mrf.mxu1 }
 0x359   : > { %v998_v63 = vadd.f32 %v996_v60, %v3708_v58 }
 0x35a   : > { %v1114_v0 = vpop.f32.mrf.mxu1 }
 0x35b   : > { %v1121_v1 = vmul.f32 0.35355338, %v1114_v0  ;;  %v1003_v2 = vsel %vm999_vm3, %v998_v63, -inf }
 0x35c   : > { %1004 = vmax.xlane.f32.xlu0 %v1003_v2  ;;  %v3167_v3 = vpop.f32.mrf.mxu1 }
 0x35d   : > { %v1123_v4 = vadd.f32 %v1121_v1, %v3705_v53 }
 0x35e   : > { %v1117_v5 = vpop.f32.mrf.mxu1 }
 0x35f   : > { %v1122_v6 = vmul.f32 0.35355338, %v1117_v5  ;;  %v1125_v7 = vsel %vm999_vm3, %v1123_v4, -inf }
 0x360   : > { %1126 = vmax.xlane.f32.xlu0 %v1125_v7  ;;  %v3168_v8 = vpop.f32.mrf.mxu1 }
 0x361   : > { %v1124_v9 = vadd.f32 %v1122_v6, %v3708_v58 }
 0x362   : > { %v1239_v10 = vpop.f32.mrf.mxu1 }
 0x363   : > { %v1246_v11 = vmul.f32 0.35355338, %v1239_v10  ;;  %v1128_v12 = vsel %vm999_vm3, %v1124_v9, -inf }
 0x364   : > { %1129 = vmax.xlane.f32.xlu0 %v1128_v12  ;;  %v3179_v13 = vpop.f32.mrf.mxu1 }
 0x365   : > { %v1248_v15 = vadd.f32 %v1246_v11, %v3705_v53 }
 0x366   : > { %v1242_v16 = vpop.f32.mrf.mxu1 }
 0x367   : > { %v1247_v17 = vmul.f32 0.35355338, %v1242_v16  ;;  %v1250_v18 = vsel %vm999_vm3, %v1248_v15, -inf }
 0x368   : > { %1251 = vmax.xlane.f32.xlu1 %v1250_v18  ;;  %v3180_v19 = vpop.f32.mrf.mxu1 }
 0x369   : > { %v1249_v20 = vadd.f32 %v1247_v17, %v3708_v58 }
 0x36a   : > { %v1364_v21 = vpop.f32.mrf.mxu1 }
 0x36b   : > { %v1371_v22 = vmul.f32 0.35355338, %v1364_v21  ;;  %v1253_v23 = vsel %vm999_vm3, %v1249_v20, -inf }
 0x36c   : > { %1254 = vmax.xlane.f32.xlu0 %v1253_v23  ;;  %v3191_v24 = vpop.f32.mrf.mxu1 }
 0x36d   : > { %v1373_v25 = vadd.f32 %v1371_v22, %v3705_v53 }
 0x36e   : > { %v1367_v26 = vpop.f32.mrf.mxu1 }
 0x36f   : > { %v1372_v27 = vmul.f32 0.35355338, %v1367_v26  ;;  %v1375_v28 = vsel %vm999_vm3, %v1373_v25, -inf }
 0x370   : > { %1376 = vmax.xlane.f32.xlu1 %v1375_v28  ;;  %v3192_v29 = vpop.f32.mrf.mxu1 }
 0x371   : > { %v1374_v30 = vadd.f32 %v1372_v27, %v3708_v58 }
 0x373   : > { %v1378_v33 = vsel %vm999_vm3, %v1374_v30, -inf }
 0x374   : > { %1379 = vmax.xlane.f32.xlu0 %v1378_v33 }
 0x381   : > { %1023 = vrot.lane.b32.xlu1 %v3663_v41, %s4033_s24  ;;  %s3794_s24 = scalar_lea.vmem %s4015_s8, %s4063_s23 }
 0x3e1   : > { %v1002_v34 = vpop.xlane.xlu1 %1001 }
 0x3e2   : > { %v1006_v35 = vsub.f32 %v997_v57, %v1002_v34 }
 0x3e4   : > { %v1008_v36 = vmul.f32 1.442695, %v1006_v35 }
 0x3e5   : > { %v1005_v37 = vpop.xlane.xlu0 %1004 }
 0x3e6   : > { %3389 = vpow2.f32 %v1008_v36  ;;  %v1007_v38 = vsub.f32 %v998_v63, %v1005_v37 }
 0x3e8   : > { %v1010_v39 = vmul.f32 1.442695, %v1007_v38 }
 0x3e9   : > { %v1127_v40 = vpop.xlane.xlu0 %1126 }
 0x3ea   : > { %3391 = vpow2.f32 %v1010_v39  ;;  %v1131_v42 = vsub.f32 %v1123_v4, %v1127_v40 }
 0x3ec   : > { %v1133_v43 = vmul.f32 1.442695, %v1131_v42 }
 0x3ed   : > { %v1130_v44 = vpop.xlane.xlu0 %1129 }
 0x3ee   : > { %3393 = vpow2.f32 %v1133_v43  ;;  %v1132_v45 = vsub.f32 %v1124_v9, %v1130_v44 }
 0x3f0   : > { %v1135_v46 = vmul.f32 1.442695, %v1132_v45 }
 0x3f1   : > { %v1252_v47 = vpop.xlane.xlu1 %1251 }
 0x3f2   : > { %3395 = vpow2.f32 %v1135_v46  ;;  %v1256_v48 = vsub.f32 %v1248_v15, %v1252_v47 }
 0x3f3   : > { %v3390_v49 = vpop.eup %3389 }
 0x3f4   : > { %v1258_v50 = vmul.f32 1.442695, %v1256_v48  ;;  %v1012_v51 = vsel %vm999_vm3, %v3390_v49, 0.0 }
 0x3f5   : > { %v1255_v52 = vpop.xlane.xlu0 %1254  ;;  %1013 = vadd.xlane.f32.xlu1 %v1012_v51 }
 0x3f6   : > { %3397 = vpow2.f32 %v1258_v50  ;;  %v1257_v54 = vsub.f32 %v1249_v20, %v1255_v52 }
 0x3f7   : > { %v3392_v55 = vpop.eup %3391 }
 0x3f8   : > { %v1260_v56 = vmul.f32 1.442695, %v1257_v54  ;;  %v1015_v57 = vsel %vm999_vm3, %v3392_v55, 0.0 }
 0x3f9   : > { %v1377_v59 = vpop.xlane.xlu1 %1376  ;;  %1016 = vadd.xlane.f32.xlu0 %v1015_v57 }
 0x3fa   : > { %3399 = vpow2.f32 %v1260_v56  ;;  %v1381_v60 = vsub.f32 %v1373_v25, %v1377_v59  ;;  %v3367_v56 = vld [vmem:[%s3625_s20 + $0x8] sm:$0xff]  }
 0x3fb   : > { %v3394_v61 = vpop.eup %3393  ;;  %3200 = vmatpush3.bf16.msra.mxu1 %v3367_v56  ;;  %v3005_v56 = vld [vmem:[%s3794_s24] ss:$0 sm:$0xff] }
 0x3fc   : > { %v1383_v62 = vmul.f32 1.442695, %v1381_v60  ;;  %v1137_v63 = vsel %vm999_vm3, %v3394_v61, 0.0  ;;  %3201 = vmatprep.subr.bf16.mxu1 %v3485_v14 }
 0x3fd   : > { %1138 = vadd.xlane.f32.xlu1 %v1137_v63  ;;  %v1024_v0 = vpop.permute.xlu1 %1023  ;;  %v1380_v1 = vpop.xlane.xlu0 %1379 }
 0x3fe   : > { %3401 = vpow2.f32 %v1383_v62  ;;  %v1382_v2 = vsub.f32 %v1374_v30, %v1380_v1  ;;  %3158 = vmatpush3.bf16.msra.mxu0 %v1024_v0  ;;  %v3368_v62 = vld [vmem:[%s3625_s20] sm:$0xff]  }
 0x3ff   : > { %v3396_v3 = vpop.eup %3395  ;;  %3169 = vmatprep.subr.bf16.mxu0 %v3485_v14  ;;  %3202 = vmatpush3.bf16.msra.mxu1 %v3368_v62 }
 0x400   : > { %v1385_v4 = vmul.f32 1.442695, %v1382_v2  ;;  %v1140_v5 = vsel %vm999_vm3, %v3396_v3, 0.0  ;;  %3215 = vmatprep.subr.bf16.mxu1 %v3485_v14 }
 0x401   : > { %1141 = vadd.xlane.f32.xlu0 %v1140_v5 }
 0x402   : > { %3403 = vpow2.f32 %v1385_v4 }
 0x403   : > { %v3398_v6 = vpop.eup %3397 }
 0x404   : > { %v1262_v7 = vsel %vm999_vm3, %v3398_v6, 0.0 }
 0x405   : > { %1263 = vadd.xlane.f32.xlu1 %v1262_v7 }
 0x407   : > { %v3400_v8 = vpop.eup %3399 }
 0x408   : > { %v1265_v9 = vsel %vm999_vm3, %v3400_v8, 0.0 }
 0x409   : > { %1266 = vadd.xlane.f32.xlu0 %v1265_v9 }
 0x40b   : > { %v3402_v10 = vpop.eup %3401 }
 0x40c   : > { %v1387_v11 = vsel %vm999_vm3, %v3402_v10, 0.0 }
 0x40d   : > { %1388 = vadd.xlane.f32.xlu1 %v1387_v11 }
 0x40f   : > { %v3404_v12 = vpop.eup %3403 }
 0x410   : > { %v1390_v13 = vsel %vm999_vm3, %v3404_v12, 0.0 }
 0x411   : > { %1391 = vadd.xlane.f32.xlu0 %v1390_v13 }
 0x41e   : > { %1273 = vrot.lane.b32.xlu1 %v3663_v41, %s4032_s19  ;;  %s3777_s19 = scalar_lea.vmem %s4014_s7, %s4063_s23 }
 0x422   : > { %1398 = vrot.lane.b32.xlu1 %v3663_v41, %s4028_s25  ;;  %s4031_s25 = smov 16  }
 0x427   : > { %1148 = vrot.lane.b32.xlu0 %v3663_v41, %s4027_s26  ;;  %s4029_s26 = smov 8  }
 0x47e   : > { %v1014_v15 = vpop.xlane.xlu1 %1013 }
 0x47f   : > { %3405 = vrcp.f32 %v1014_v15 }
 0x482   : > { %v1017_v16 = vpop.xlane.xlu0 %1016 }
 0x483   : > { %3407 = vrcp.f32 %v1017_v16 }
 0x486   : > { %v1139_v18 = vpop.xlane.xlu1 %1138 }
 0x48a   : > { %v1142_v17 = vpop.xlane.xlu0 %1141 }
 0x48b   : > { %3409 = vrcp.f32 %v1142_v17 }
 0x48c   : > { %v3406_v19 = vpop.eup %3405  ;;  %3411 = vrcp.f32 %v1139_v18 }
 0x48d   : > { %v1020_v21 = vmul.f32 %v3406_v19, %v3390_v49 }
 0x48e   : > { %v1264_v24 = vpop.xlane.xlu1 %1263 }
 0x490   : > { %v3408_v20 = vpop.eup %3407 }
 0x491   : > { %v1021_v22 = vmul.f32 %v3408_v20, %v3392_v55 }
 0x492   : > { %v1267_v23 = vpop.xlane.xlu0 %1266 }
 0x493   : > { %v1022_v25 = vpack.c.bf16 %v1021_v22, %v1020_v21  ;;  %3413 = vrcp.f32 %v1267_v23 }
 0x494   : > { %3415 = vrcp.f32 %v1264_v24  ;;  %v3001_v24 = vld [vmem:[%s3777_s19] ss:$0 sm:$0xff] }
 0x495   : > { %3160 = vmatmul.mubr.msk.bf16.vlgmr.msra.gmra.mxu0 %vm999_vm3, %v1022_v25 }
 0x496   : > { %3171 = vmatprep.mubr.msk.bf16.mxu0 %vm3486_vm1, %v3485_v14  ;;  %v1389_v28 = vpop.xlane.xlu1 %1388 }
 0x498   : > { %v3410_v41 = vpop.eup %3409 }
 0x499   : > { %v3412_v27 = vpop.eup %3411  ;;  %v1146_v29 = vmul.f32 %v3410_v41, %v3396_v3 }
 0x49a   : > { %v1392_v26 = vpop.xlane.xlu0 %1391  ;;  %v1145_v33 = vmul.f32 %v3412_v27, %v3394_v61  ;;  %v1274_v36 = vpop.permute.xlu1 %1273 }
 0x49b   : > { %3417 = vrcp.f32 %v1392_v26 }
 0x49c   : > { %3419 = vrcp.f32 %v1389_v28  ;;  %v1147_v34 = vpack.c.bf16 %v1146_v29, %v1145_v33 }
 0x49e   : > { %v1149_v30 = vpop.permute.xlu0 %1148  ;;  %v1399_v43 = vpop.permute.xlu1 %1398 }
 0x49f   : > { %3170 = vmatpush3.bf16.msra.mxu0 %v1149_v30 }
 0x4a0   : > { %3181 = vmatprep.subr.bf16.mxu0 %v3485_v14  ;;  %v3414_v35 = vpop.eup %3413 }
 0x4a1   : > { %v3416_v37 = vpop.eup %3415  ;;  %v1271_v38 = vmul.f32 %v3414_v35, %v3400_v8 }
 0x4a2   : > { %3172 = vmatmul.mubr.msk.bf16.vlgmr.msra.gmra.mxu0 %vm999_vm3, %v1147_v34  ;;  %v1270_v39 = vmul.f32 %v3416_v37, %v3398_v6 }
 0x4a3   : > { %3182 = vmatpush3.bf16.msra.mxu0 %v1274_v36  ;;  %3183 = vmatprep.mubr.msk.bf16.mxu0 %vm3486_vm1, %v3485_v14 }
 0x4a4   : > { %3193 = vmatprep.subr.bf16.mxu0 %v3485_v14  ;;  %v1272_v40 = vpack.c.bf16 %v1271_v38, %v1270_v39 }
 0x4a8   : > { %v3418_v42 = vpop.eup %3417 }
 0x4a9   : > { %v3420_v44 = vpop.eup %3419  ;;  %v1396_v45 = vmul.f32 %v3418_v42, %v3404_v12 }
 0x4aa   : > { %3184 = vmatmul.mubr.msk.bf16.vlgmr.msra.gmra.mxu0 %vm999_vm3, %v1272_v40  ;;  %v1395_v46 = vmul.f32 %v3420_v44, %v3402_v10 }
 0x4ab   : > { %3194 = vmatpush3.bf16.msra.mxu0 %v1399_v43  ;;  %3195 = vmatprep.mubr.msk.bf16.mxu0 %vm3486_vm1, %v3485_v14 }
 0x4ac   : > { %3207 = vmatprep.subr.bf16.mxu0 %v3485_v14  ;;  %v1397_v47 = vpack.c.bf16 %v1396_v45, %v1395_v46  ;;  %v3370_v46 = vld [vmem:[%s3631_s27] sm:$0xff]  }
 0x4b2   : > { %3196 = vmatmul.mubr.msk.bf16.vlgmr.msra.gmra.mxu0 %vm999_vm3, %v1397_v47 }
 0x4b3   : > { %3211 = vmatprep.mubr.msk.bf16.mxu0 %vm3486_vm1, %v3485_v14 }
 0x555   : > { %v1063_v48 = vpop.f32.mrf.mxu0 }
 0x557   : > { %v3161_v49 = vpop.f32.mrf.mxu0 }
 0x559   : > { %v1066_v50 = vpop.f32.mrf.mxu0 }
 0x55b   : > { %v3162_v51 = vpop.f32.mrf.mxu0 }
 0x562   : > { %v1188_v52 = vpop.f32.mrf.mxu0 }
 0x564   : > { %v3173_v54 = vpop.f32.mrf.mxu0 }
 0x566   : > { %v1191_v55 = vpop.f32.mrf.mxu0 }
 0x567   : > { %v3335_v57 = vpack.i.bf16 %v1191_v55, %v1188_v52 }
 0x568   : > { %v3174_v59 = vpop.f32.mrf.mxu0 }
 0x569   : > { %3336 = vrot.lane.b32.xlu1 %v3335_v57, %s4029_s26  ;;  %s4030_s26 = smov 24  }
 0x56a   : > { %v1313_v60 = vpop.f32.mrf.mxu0 }
 0x56c   : > { %v3185_v61 = vpop.f32.mrf.mxu0 }
 0x56d   : > { %v3006_v61 = vld [vmem:[%s3801_s30] ss:$0 sm:$0xff] }
 0x56e   : > { %v1316_v63 = vpop.f32.mrf.mxu0 }
 0x56f   : > { %v3340_v0 = vpack.i.bf16 %v1316_v63, %v1313_v60 }
 0x570   : > { %v3186_v1 = vpop.f32.mrf.mxu0 }
 0x571   : > { %3341 = vrot.lane.b32.xlu0 %v3340_v0, %s4031_s25  ;;  %s3082_s25 = sshll.u32 %s4063_s23, 5  ;;  %s4049_s23 = smov 96  }
 0x572   : > { %v1438_v2 = vpop.f32.mrf.mxu0  ;;  %s3811_s18 = scalar_lea.vmem %s4019_s12, %s3082_s25  ;;  %s4050_s25 = smov 120  }
 0x574   : > { %v3197_v3 = vpop.f32.mrf.mxu0 }
 0x575   : > { %v3372_v3 = vld [vmem:[%s3811_s18 + $0x10] sm:$0xff]  }
 0x576   : > { %v1441_v4 = vpop.f32.mrf.mxu0 }
 0x577   : > { %v3345_v5 = vpack.i.bf16 %v1441_v4, %v1438_v2  ;;  %v3371_v2 = vld [vmem:[%s3811_s18 + $0x18] sm:$0xff]   ;;  %v3373_v4 = vld [vmem:[%s3811_s18 + $0x8] sm:$0xff]  }
 0x578   : > { %v3198_v6 = vpop.f32.mrf.mxu0 }
 0x579   : > { %3346 = vrot.lane.b32.xlu1 %v3345_v5, %s4030_s26  ;;  %v3374_v5 = vld [vmem:[%s3811_s18] sm:$0xff]   ;;  %s4051_s26 = smov 112  }
 0x57a   : > { %v3007_v6 = vld [vmem:[%s3825_s0] ss:$0 sm:$0xff] }
 0x5db   : > { %v3337_v7 = vpop.permute.xlu1 %3336 }
 0x5dc   : > { %v3339_v9 = vunpack.i.h.bf16 %v3337_v7  ;;  %v3338_v10 = vunpack.i.l.bf16 %v3337_v7 }
 0x5de   : > { %v1470_v15 = vsel %vm947_vm2, %v1066_v50, %v3339_v9  ;;  %v1469_v16 = vsel %vm947_vm2, %v1063_v48, %v3338_v10 }
 0x5e3   : > { %v3342_v8 = vpop.permute.xlu0 %3341 }
 0x5e4   : > { %v3344_v11 = vunpack.i.h.bf16 %v3342_v8  ;;  %v3343_v12 = vunpack.i.l.bf16 %v3342_v8 }
 0x5e6   : > { %v1472_v19 = vsel %vm999_vm3, %v1470_v15, %v3344_v11  ;;  %v1471_v20 = vsel %vm999_vm3, %v1469_v16, %v3343_v12 }
 0x5eb   : > { %v3347_v13 = vpop.permute.xlu1 %3346 }
 0x5ec   : > { %v3349_v17 = vunpack.i.h.bf16 %v3347_v13  ;;  %v3348_v18 = vunpack.i.l.bf16 %v3347_v13 }
 0x5ee   : > { %v1475_v21 = vsel %vm1473_vm4, %v1472_v19, %v3349_v17  ;;  %v1474_v22 = vsel %vm1473_vm4, %v1471_v20, %v3348_v18 }
 0x5ef   : > { %v1480_v23 = vpack.c.bf16 %v1475_v21, %v1474_v22 }
 0x5f1   : > { %3204 = vmatmul.mubr.msk.bf16.vlgmr.msra.gmra.mxu1 %vm829_vm0, %v1480_v23 }
 0x5f2   : > { %3223 = vmatprep.mubr.msk.bf16.mxu1 %vm3486_vm1, %v3485_v14  ;;  %3216 = vmatpush3.bf16.msra.mxu1 %v3371_v2  ;;  %v3017_v2 = vld [vmem:[%s3850_s1] ss:$0 sm:$0xff] }
 0x5f3   : > { %3217 = vmatprep.subr.bf16.mxu1 %v3485_v14 }
 0x5f6   : > { %3218 = vmatpush3.bf16.msra.mxu1 %v3372_v3 }
 0x5f7   : > { %3219 = vmatprep.subr.bf16.mxu1 %v3485_v14 }
 0x5fa   : > { %3220 = vmatpush3.bf16.msra.mxu1 %v3373_v4 }
 0x5fb   : > { %3221 = vmatprep.subr.bf16.mxu1 %v3485_v14 }
 0x5fe   : > { %3222 = vmatpush3.bf16.msra.mxu1 %v3374_v5 }
 0x5ff   : > { %3241 = vmatprep.subr.bf16.mxu1 %v3485_v14 }
 0x6b1   : > { %v1537_v25 = vpop.f32.mrf.mxu1 }
 0x6b2   : > { %v1538_v41 = vadd.f32 %v3001_v24, %v1537_v25 }
 0x6b3   : > { %v3205_v26 = vpop.f32.mrf.mxu1 }
 0x6b4   : > { %v1544_v27 = vadd.f32 %v1538_v41, %v3647_v31 }
 0x6b5   : > { %v1540_v28 = vpop.f32.mrf.mxu1 }
 0x6b6   : > { %v1541_v29 = vadd.f32 %v3001_v24, %v1540_v28  ;;  %v1548_v30 = vsel %vm829_vm0, %v1544_v27, 0.0 }
 0x6b7   : > { %1549 = vadd.xlane.f32.xlu0 %v1548_v30  ;;  %v3206_v33 = vpop.f32.mrf.mxu1 }
 0x6b8   : > { %v1545_v34 = vadd.f32 %v1541_v29, %v3649_v32  ;;  %v3369_v32 = vld [vmem:[%s3631_s27 + $0x8] sm:$0xff]  }
 0x6b9   : > { %3208 = vmatpush3.bf16.msra.mxu0 %v3369_v32 }
 0x6ba   : > { %v1551_v35 = vsel %vm829_vm0, %v1545_v34, 0.0  ;;  %3209 = vmatprep.subr.bf16.mxu0 %v3485_v14 }
 0x6bb   : > { %1552 = vadd.xlane.f32.xlu1 %v1551_v35 }
 0x6bd   : > { %3210 = vmatpush3.bf16.msra.mxu0 %v3370_v46 }
 0x6be   : > { %3227 = vmatprep.subr.bf16.mxu0 %v3485_v14 }
 0x740   : > { %v1550_v36 = vpop.xlane.xlu0 %1549 }
 0x741   : > { %v1554_v37 = vmul.f32 0.03125, %v1550_v36 }
 0x743   : > { %v1556_v38 = vsub.f32 %v1544_v27, %v1554_v37 }
 0x744   : > { %v1553_v39 = vpop.xlane.xlu1 %1552 }
 0x745   : > { %v1555_v40 = vmul.f32 0.03125, %v1553_v39  ;;  %v1558_v42 = vmul.f32 %v1556_v38, %v1556_v38 }
 0x747   : > { %v1557_v31 = vsub.f32 %v1545_v34, %v1555_v40  ;;  %v1560_v43 = vsel %vm829_vm0, %v1558_v42, 0.0  ;;  %v3011_v34 = vld [vmem:[%s3835_s29] ss:$0 sm:$0xff] }
 0x748   : > { %1561 = vadd.xlane.f32.xlu0 %v1560_v43 }
 0x749   : > { %v1559_v44 = vmul.f32 %v1557_v31, %v1557_v31 }
 0x74b   : > { %v1563_v45 = vsel %vm829_vm0, %v1559_v44, 0.0 }
 0x74c   : > { %1564 = vadd.xlane.f32.xlu0 %v1563_v45 }
 0x7d1   : > { %v1562_v47 = vpop.xlane.xlu0 %1561 }
 0x7d2   : > { %v1566_v48 = vmul.f32 0.03125, %v1562_v47 }
 0x7d4   : > { %v1568_v49 = vadd.f32 1e-12, %v1566_v48 }
 0x7d5   : > { %v1565_v50 = vpop.xlane.xlu0 %1564 }
 0x7d6   : > { %3421 = vrsqrt.f32 %v1568_v49  ;;  %v1567_v51 = vmul.f32 0.03125, %v1565_v50 }
 0x7d8   : > { %v1569_v52 = vadd.f32 1e-12, %v1567_v51 }
 0x7da   : > { %3423 = vrsqrt.f32 %v1569_v52 }
 0x7e3   : > { %v3422_v54 = vpop.eup %3421 }
 0x7e4   : > { %v1572_v55 = vmul.f32 %v3422_v54, %v1556_v38 }
 0x7e6   : > { %v1580_v60 = vmul.f32 %v3005_v56, %v1572_v55  ;;  %v3375_v55 = vld [vmem:[%s3614_s17 + $0x18] sm:$0xff]  }
 0x7e7   : > { %v3424_v57 = vpop.eup %3423 }
 0x7e8   : > { %v1573_v59 = vmul.f32 %v3424_v57, %v1557_v31  ;;  %v1588_v63 = vadd.f32 %v3006_v61, %v1580_v60 }
 0x7ea   : > { %v1581_v62 = vmul.f32 %v3005_v56, %v1573_v59  ;;  %v3376_v56 = vld [vmem:[%s3614_s17 + $0x10] sm:$0xff]   ;;  %s4053_s17 = smov 104  }
 0x7ec   : > { %v1589_v0 = vadd.f32 %v3006_v61, %v1581_v62 }
 0x7ee   : > { %v1594_v1 = vpack.c.bf16 %v1589_v0, %v1588_v63 }
 0x7f0   : > { %3212 = vmatmul.mubr.msk.bf16.vlgmr.msra.gmra.mxu0 %vm829_vm0, %v1594_v1 }
 0x7f1   : > { %3231 = vmatprep.mubr.msk.bf16.mxu0 %vm3486_vm1, %v3485_v14  ;;  %3228 = vmatpush3.bf16.msra.mxu0 %v3375_v55 }
 0x7f2   : > { %3229 = vmatprep.subr.bf16.mxu0 %v3485_v14 }
 0x7f5   : > { %3230 = vmatpush3.bf16.msra.mxu0 %v3376_v56 }
 0x7f6   : > { %3235 = vmatprep.subr.bf16.mxu0 %v3485_v14 }
 0x8b0   : > { %v1651_v7 = vpop.f32.mrf.mxu0 }
 0x8b1   : > { %v1652_v8 = vadd.f32 %v3007_v6, %v1651_v7 }
 0x8b2   : > { %v3213_v9 = vpop.f32.mrf.mxu0 }
 0x8b3   : > { %v1658_v10 = vmul.f32 %v1652_v8, %v1652_v8 }
 0x8b4   : > { %v1654_v11 = vpop.f32.mrf.mxu0 }
 0x8b5   : > { %v1660_v12 = vmul.f32 %v1658_v10, %v1652_v8  ;;  %v1655_v13 = vadd.f32 %v3007_v6, %v1654_v11  ;;  %v3018_v6 = vld [vmem:[%s3857_s3] ss:$0 sm:$0xff] }
 0x8b6   : > { %v3214_v15 = vpop.f32.mrf.mxu0 }
 0x8b7   : > { %v1662_v16 = vmul.f32 0.044715, %v1660_v12  ;;  %v1659_v17 = vmul.f32 %v1655_v13, %v1655_v13  ;;  %v3024_v12 = vld [vmem:[%s3660_s28 + $0x1] ss:$0 sm:$0xff]  ;;  %s4052_s28 = smov 80  }
 0x8b9   : > { %v1664_v18 = vadd.f32 %v1662_v16, %v1652_v8  ;;  %v1661_v19 = vmul.f32 %v1659_v17, %v1655_v13 }
 0x8bb   : > { %v1666_v20 = vmul.f32 0.7978846, %v1664_v18  ;;  %v1663_v21 = vmul.f32 0.044715, %v1661_v19 }
 0x8bd   : > { %3425 = vtanh.f32 %v1666_v20  ;;  %v1665_v22 = vadd.f32 %v1663_v21, %v1655_v13 }
 0x8bf   : > { %v1667_v23 = vmul.f32 0.7978846, %v1665_v22 }
 0x8c1   : > { %3427 = vtanh.f32 %v1667_v23 }
 0x8ca   : > { %v3426_v24 = vpop.eup %3425 }
 0x8cb   : > { %v1670_v25 = vadd.f32 1.0, %v3426_v24 }
 0x8cd   : > { %v1672_v26 = vmul.f32 0.5, %v1670_v25 }
 0x8ce   : > { %v3428_v41 = vpop.eup %3427 }
 0x8cf   : > { %v1671_v27 = vadd.f32 1.0, %v3428_v41  ;;  %v1674_v29 = vmul.f32 %v1672_v26, %v1652_v8 }
 0x8d1   : > { %v1673_v28 = vmul.f32 0.5, %v1671_v27 }
 0x8d3   : > { %v1675_v30 = vmul.f32 %v1673_v28, %v1655_v13 }
 0x8d5   : > { %v1684_v33 = vpack.c.bf16 %v1675_v30, %v1674_v29 }
 0x8d7   : > { %3224 = vmatmul.mubr.msk.bf16.vlgmr.msra.gmra.mxu1 %vm1716_vm5, %v1684_v33 }
 0x8d8   : > { %3243 = vmatprep.mubr.msk.bf16.mxu1 %vm3486_vm1, %v3485_v14 }
 0x997   : > { %v1754_v35 = vpop.f32.mrf.mxu1 }
 0x998   : > { %v1755_v36 = vadd.f32 %v3011_v34, %v1754_v35 }
 0x999   : > { %v3225_v37 = vpop.f32.mrf.mxu1 }
 0x99a   : > { %v1761_v38 = vadd.f32 %v1755_v36, %v1588_v63 }
 0x99b   : > { %v1757_v39 = vpop.f32.mrf.mxu1 }
 0x99c   : > { %v1758_v40 = vadd.f32 %v3011_v34, %v1757_v39  ;;  %v1765_v42 = vsel %vm829_vm0, %v1761_v38, 0.0 }
 0x99d   : > { %1766 = vadd.xlane.f32.xlu0 %v1765_v42  ;;  %v3226_v31 = vpop.f32.mrf.mxu1 }
 0x99e   : > { %v1762_v43 = vadd.f32 %v1758_v40, %v1589_v0 }
 0x9a0   : > { %v1768_v44 = vsel %vm829_vm0, %v1762_v43, 0.0 }
 0x9a1   : > { %1769 = vadd.xlane.f32.xlu1 %v1768_v44 }
 0xa26   : > { %v1767_v45 = vpop.xlane.xlu0 %1766 }
 0xa27   : > { %v1771_v32 = vmul.f32 0.03125, %v1767_v45 }
 0xa29   : > { %v1773_v46 = vsub.f32 %v1761_v38, %v1771_v32 }
 0xa2a   : > { %v1770_v47 = vpop.xlane.xlu1 %1769 }
 0xa2b   : > { %v1772_v48 = vmul.f32 0.03125, %v1770_v47  ;;  %v1775_v49 = vmul.f32 %v1773_v46, %v1773_v46 }
 0xa2d   : > { %v1774_v50 = vsub.f32 %v1762_v43, %v1772_v48  ;;  %v1777_v51 = vsel %vm829_vm0, %v1775_v49, 0.0 }
 0xa2e   : > { %1778 = vadd.xlane.f32.xlu0 %v1777_v51 }
 0xa2f   : > { %v1776_v52 = vmul.f32 %v1774_v50, %v1774_v50 }
 0xa31   : > { %v1780_v54 = vsel %vm829_vm0, %v1776_v52, 0.0 }
 0xa32   : > { %1781 = vadd.xlane.f32.xlu1 %v1780_v54 }
 0xab7   : > { %v1779_v57 = vpop.xlane.xlu0 %1778 }
 0xab8   : > { %v1783_v59 = vmul.f32 0.03125, %v1779_v57 }
 0xaba   : > { %v1785_v60 = vadd.f32 1e-12, %v1783_v59 }
 0xabb   : > { %v1782_v61 = vpop.xlane.xlu1 %1781 }
 0xabc   : > { %3429 = vrsqrt.f32 %v1785_v60  ;;  %v1784_v62 = vmul.f32 0.03125, %v1782_v61 }
 0xabe   : > { %v1786_v63 = vadd.f32 1e-12, %v1784_v62 }
 0xac0   : > { %3431 = vrsqrt.f32 %v1786_v63 }
 0xac9   : > { %v3430_v0 = vpop.eup %3429 }
 0xaca   : > { %v1789_v1 = vmul.f32 %v3430_v0, %v1773_v46 }
 0xacc   : > { %v1797_v5 = vmul.f32 %v3017_v2, %v1789_v1 }
 0xacd   : > { %v3432_v3 = vpop.eup %3431 }
 0xace   : > { %v1790_v4 = vmul.f32 %v3432_v3, %v1774_v50  ;;  %v3860_v8 = vadd.f32 %v3018_v6, %v1797_v5 }
 0xad0   : > { %v1798_v7 = vmul.f32 %v3017_v2, %v1790_v4 }
 0xad2   : > { %v3862_v9 = vadd.f32 %v3018_v6, %v1798_v7 }
 0xad4   : > { %v1812_v10 = vpack.c.bf16 %v3862_v9, %v3860_v8 }
 0xad6   : > { %3232 = vmatmul.mubr.msk.bf16.vlgmr.msra.gmra.mxu0 %vm829_vm0, %v1812_v10 }
 0xad7   : > { %3237 = vmatprep.mubr.msk.bf16.mxu0 %vm3486_vm1, %v3485_v14 }
 0xb96   : > { %v1870_v11 = vpop.f32.mrf.mxu0 }
 0xb97   : > { %v1871_v16 = vadd.f32 %v3024_v12, %v1870_v11 }
 0xb98   : > { %v3233_v13 = vpop.f32.mrf.mxu0 }
 0xb9a   : > { %v1873_v15 = vpop.f32.mrf.mxu0 }
 0xb9b   : > { %v1874_v17 = vadd.f32 %v3024_v12, %v1873_v15 }
 0xb9c   : > { %v3234_v18 = vpop.f32.mrf.mxu0 }
 0xb9d   : > { %v3870_v19 = vpack.c.bf16 %v1874_v17, %v1871_v16 }
 0xb9f   : > { %2004 = vrot.lane.b32.xlu1 %v3870_v19, %s4048_s2  ;;  %1879 = vrot.lane.b32.xlu0 %v3870_v19, %s4049_s23  ;;  %s4056_s2 = smov 48   ;;  %s4057_s23 = smov 40  }
 0xba3   : > { %2002 = vrot.lane.b32.xlu1 %v3870_v19, %s4050_s25  ;;  %2127 = vrot.lane.b32.xlu0 %v3870_v19, %s4051_s26  ;;  %s4058_s25 = smov 56   ;;  %s4059_s26 = smov 8  }
 0xba7   : > { %2129 = vrot.lane.b32.xlu1 %v3870_v19, %s4052_s28  ;;  %2252 = vrot.lane.b32.xlu0 %v3870_v19, %s4053_s17  ;;  %s4060_s28 = smov 16   ;;  %s4061_s17 = smov 24  }
 0xbab   : > { %2254 = vrot.lane.b32.xlu1 %v3870_v19, %s4054_s4  ;;  %s4055_s4 = smov 64  }
 0xc11   : > { %v1880_v20 = vpop.permute.xlu0 %1879  ;;  %v2005_v22 = vpop.permute.xlu1 %2004 }
 0xc12   : > { %v1885_v21 = vsel %vm947_vm2, %v1880_v20, 0  ;;  %v2010_v24 = vsel %vm947_vm2, %v2005_v22, 0 }
 0xc13   : > { %3236 = vmatpush3.bf16.xpose.msra.mxu0 %v1885_v21 }
 0xc14   : > { %3247 = vmatprep.subr.bf16.mxu0 %v3485_v14 }
 0xc15   : > { %v2003_v23 = vpop.permute.xlu1 %2002  ;;  %v2128_v27 = vpop.permute.xlu0 %2127 }
 0xc19   : > { %v2130_v25 = vpop.permute.xlu1 %2129  ;;  %v2253_v29 = vpop.permute.xlu0 %2252 }
 0xc1a   : > { %3238 = vmatmul.mubr.msk.bf16.vlgmr.msra.gmra.mxu0 %vm947_vm2, %v3870_v19  ;;  %v2135_v41 = vsel %vm947_vm2, %v2130_v25, 0 }
 0xc1b   : > { %3248 = vmatpush3.bf16.xpose.msra.mxu0 %v2010_v24  ;;  %3249 = vmatprep.mubr.msk.bf16.mxu0 %vm3486_vm1, %v3485_v14 }
 0xc1c   : > { %3259 = vmatprep.subr.bf16.mxu0 %v3485_v14 }
 0xc1d   : > { %v2255_v26 = vpop.permute.xlu1 %2254 }
 0xc1e   : > { %v2260_v28 = vsel %vm947_vm2, %v2255_v26, 0 }
 0xc22   : > { %3250 = vmatmul.mubr.msk.bf16.vlgmr.msra.gmra.mxu0 %vm947_vm2, %v2003_v23 }
 0xc23   : > { %3260 = vmatpush3.bf16.xpose.msra.mxu0 %v2135_v41  ;;  %3261 = vmatprep.mubr.msk.bf16.mxu0 %vm3486_vm1, %v3485_v14 }
 0xc24   : > { %3271 = vmatprep.subr.bf16.mxu0 %v3485_v14 }
 0xc2a   : > { %3262 = vmatmul.mubr.msk.bf16.vlgmr.msra.gmra.mxu0 %vm947_vm2, %v2128_v27 }
 0xc2b   : > { %3272 = vmatpush3.bf16.xpose.msra.mxu0 %v2260_v28  ;;  %3273 = vmatprep.mubr.msk.bf16.mxu0 %vm3486_vm1, %v3485_v14 }
 0xc2c   : > { %3283 = vmatprep.subr.bf16.mxu0 %v3485_v14 }
 0xc32   : > { %3274 = vmatmul.mubr.msk.bf16.vlgmr.msra.gmra.mxu0 %vm947_vm2, %v2253_v29 }
 0xc33   : > { %3287 = vmatprep.mubr.msk.bf16.mxu0 %vm3486_vm1, %v3485_v14 }
 0xcda   : > { %v1921_v30 = vpop.f32.mrf.mxu0 }
 0xcdb   : > { %v1928_v33 = vmul.f32 0.35355338, %v1921_v30 }
 0xcdc   : > { %v3239_v34 = vpop.f32.mrf.mxu0 }
 0xcdd   : > { %v1930_v35 = vadd.f32 %v1928_v33, %v3705_v53 }
 0xcde   : > { %v1924_v36 = vpop.f32.mrf.mxu0 }
 0xcdf   : > { %v1929_v37 = vmul.f32 0.35355338, %v1924_v36  ;;  %v1932_v38 = vsel %vm999_vm3, %v1930_v35, -inf }
 0xce0   : > { %1933 = vmax.xlane.f32.xlu1 %v1932_v38  ;;  %v3240_v39 = vpop.f32.mrf.mxu0 }
 0xce1   : > { %v1931_v40 = vadd.f32 %v1929_v37, %v3708_v58 }
 0xce2   : > { %v2046_v42 = vpop.f32.mrf.mxu0 }
 0xce3   : > { %v2053_v31 = vmul.f32 0.35355338, %v2046_v42  ;;  %v1935_v43 = vsel %vm999_vm3, %v1931_v40, -inf }
 0xce4   : > { %1936 = vmax.xlane.f32.xlu0 %v1935_v43  ;;  %v3251_v44 = vpop.f32.mrf.mxu0 }
 0xce5   : > { %v2055_v45 = vadd.f32 %v2053_v31, %v3705_v53 }
 0xce6   : > { %v2049_v32 = vpop.f32.mrf.mxu0 }
 0xce7   : > { %v2054_v46 = vmul.f32 0.35355338, %v2049_v32  ;;  %v2057_v47 = vsel %vm999_vm3, %v2055_v45, -inf }
 0xce8   : > { %2058 = vmax.xlane.f32.xlu0 %v2057_v47  ;;  %v3252_v48 = vpop.f32.mrf.mxu0 }
 0xce9   : > { %v2056_v49 = vadd.f32 %v2054_v46, %v3708_v58 }
 0xcea   : > { %v2171_v50 = vpop.f32.mrf.mxu0 }
 0xceb   : > { %v2178_v51 = vmul.f32 0.35355338, %v2171_v50  ;;  %v2060_v52 = vsel %vm999_vm3, %v2056_v49, -inf }
 0xcec   : > { %2061 = vmax.xlane.f32.xlu0 %v2060_v52  ;;  %v3263_v54 = vpop.f32.mrf.mxu0 }
 0xced   : > { %v2180_v55 = vadd.f32 %v2178_v51, %v3705_v53 }
 0xcee   : > { %v2174_v56 = vpop.f32.mrf.mxu0 }
 0xcef   : > { %v2179_v57 = vmul.f32 0.35355338, %v2174_v56  ;;  %v2182_v59 = vsel %vm999_vm3, %v2180_v55, -inf }
 0xcf0   : > { %2183 = vmax.xlane.f32.xlu1 %v2182_v59  ;;  %v3264_v60 = vpop.f32.mrf.mxu0 }
 0xcf1   : > { %v2181_v61 = vadd.f32 %v2179_v57, %v3708_v58 }
 0xcf2   : > { %v2296_v62 = vpop.f32.mrf.mxu0 }
 0xcf3   : > { %v2303_v63 = vmul.f32 0.35355338, %v2296_v62  ;;  %v2185_v0 = vsel %vm999_vm3, %v2181_v61, -inf }
 0xcf4   : > { %2186 = vmax.xlane.f32.xlu0 %v2185_v0  ;;  %v3275_v1 = vpop.f32.mrf.mxu0 }
 0xcf5   : > { %v2305_v2 = vadd.f32 %v2303_v63, %v3705_v53 }
 0xcf6   : > { %v2299_v3 = vpop.f32.mrf.mxu0 }
 0xcf7   : > { %v2304_v4 = vmul.f32 0.35355338, %v2299_v3  ;;  %v2307_v5 = vsel %vm999_vm3, %v2305_v2, -inf }
 0xcf8   : > { %2308 = vmax.xlane.f32.xlu1 %v2307_v5  ;;  %v3276_v6 = vpop.f32.mrf.mxu0 }
 0xcf9   : > { %v2306_v7 = vadd.f32 %v2304_v4, %v3708_v58 }
 0xcfb   : > { %v2310_v10 = vsel %vm999_vm3, %v2306_v7, -inf }
 0xcfc   : > { %2311 = vmax.xlane.f32.xlu0 %v2310_v10 }
 0xd09   : > { %1955 = vrot.lane.b32.xlu1 %v3870_v19, %s4055_s4 }
 0xd69   : > { %v1934_v11 = vpop.xlane.xlu1 %1933 }
 0xd6a   : > { %v1938_v12 = vsub.f32 %v1930_v35, %v1934_v11 }
 0xd6c   : > { %v1940_v13 = vmul.f32 1.442695, %v1938_v12 }
 0xd6d   : > { %v1937_v15 = vpop.xlane.xlu0 %1936 }
 0xd6e   : > { %3433 = vpow2.f32 %v1940_v13  ;;  %v1939_v53 = vsub.f32 %v1931_v40, %v1937_v15 }
 0xd70   : > { %v1942_v16 = vmul.f32 1.442695, %v1939_v53 }
 0xd71   : > { %v2059_v17 = vpop.xlane.xlu0 %2058 }
 0xd72   : > { %3435 = vpow2.f32 %v1942_v16  ;;  %v2063_v18 = vsub.f32 %v2055_v45, %v2059_v17 }
 0xd74   : > { %v2065_v20 = vmul.f32 1.442695, %v2063_v18 }
 0xd75   : > { %v2062_v21 = vpop.xlane.xlu0 %2061 }
 0xd76   : > { %3437 = vpow2.f32 %v2065_v20  ;;  %v2064_v58 = vsub.f32 %v2056_v49, %v2062_v21 }
 0xd78   : > { %v2067_v22 = vmul.f32 1.442695, %v2064_v58 }
 0xd79   : > { %v2184_v23 = vpop.xlane.xlu1 %2183 }
 0xd7a   : > { %3439 = vpow2.f32 %v2067_v22  ;;  %v2188_v24 = vsub.f32 %v2180_v55, %v2184_v23 }
 0xd7b   : > { %v3434_v25 = vpop.eup %3433 }
 0xd7c   : > { %v2190_v41 = vmul.f32 1.442695, %v2188_v24  ;;  %v1944_v26 = vsel %vm999_vm3, %v3434_v25, 0.0 }
 0xd7d   : > { %v2187_v27 = vpop.xlane.xlu0 %2186  ;;  %1945 = vadd.xlane.f32.xlu1 %v1944_v26 }
 0xd7e   : > { %3441 = vpow2.f32 %v2190_v41  ;;  %v2189_v28 = vsub.f32 %v2181_v61, %v2187_v27 }
 0xd7f   : > { %v3436_v29 = vpop.eup %3435 }
 0xd80   : > { %v2192_v30 = vmul.f32 1.442695, %v2189_v28  ;;  %v1947_v33 = vsel %vm999_vm3, %v3436_v29, 0.0  ;;  %v3377_v28 = vld [vmem:[%s3625_s20 + $0x18] sm:$0xff]  }
 0xd81   : > { %v2309_v34 = vpop.xlane.xlu1 %2308  ;;  %1948 = vadd.xlane.f32.xlu0 %v1947_v33  ;;  %3284 = vmatpush3.bf16.msra.mxu0 %v3377_v28 }
 0xd82   : > { %3443 = vpow2.f32 %v2192_v30  ;;  %v2313_v35 = vsub.f32 %v2305_v2, %v2309_v34  ;;  %3285 = vmatprep.subr.bf16.mxu0 %v3485_v14 }
 0xd83   : > { %v3438_v36 = vpop.eup %3437 }
 0xd84   : > { %v2315_v37 = vmul.f32 1.442695, %v2313_v35  ;;  %v2069_v38 = vsel %vm999_vm3, %v3438_v36, 0.0  ;;  %v3378_v35 = vld [vmem:[%s3625_s20 + $0x10] sm:$0xff]   ;;  %s2986_s20 = sshll.u32 %s4065_s22, 1 }
 0xd85   : > { %2070 = vadd.xlane.f32.xlu1 %v2069_v38  ;;  %v1956_v39 = vpop.permute.xlu1 %1955  ;;  %v2312_v40 = vpop.xlane.xlu0 %2311  ;;  %3286 = vmatpush3.bf16.msra.mxu0 %v3378_v35 }
 0xd86   : > { %3445 = vpow2.f32 %v2315_v37  ;;  %v2314_v42 = vsub.f32 %v2306_v7, %v2312_v40  ;;  %3242 = vmatpush3.bf16.msra.mxu1 %v1956_v39  ;;  %3299 = vmatprep.subr.bf16.mxu0 %v3485_v14 }
 0xd87   : > { %v3440_v31 = vpop.eup %3439  ;;  %3253 = vmatprep.subr.bf16.mxu1 %v3485_v14 }
 0xd88   : > { %v2317_v43 = vmul.f32 1.442695, %v2314_v42  ;;  %v2072_v44 = vsel %vm999_vm3, %v3440_v31, 0.0 }
 0xd89   : > { %2073 = vadd.xlane.f32.xlu0 %v2072_v44 }
 0xd8a   : > { %3447 = vpow2.f32 %v2317_v43 }
 0xd8b   : > { %v3442_v45 = vpop.eup %3441 }
 0xd8c   : > { %v2194_v32 = vsel %vm999_vm3, %v3442_v45, 0.0 }
 0xd8d   : > { %2195 = vadd.xlane.f32.xlu1 %v2194_v32 }
 0xd8f   : > { %v3444_v46 = vpop.eup %3443 }
 0xd90   : > { %v2197_v47 = vsel %vm999_vm3, %v3444_v46, 0.0 }
 0xd91   : > { %2198 = vadd.xlane.f32.xlu0 %v2197_v47 }
 0xd93   : > { %v3446_v48 = vpop.eup %3445 }
 0xd94   : > { %v2319_v49 = vsel %vm999_vm3, %v3446_v48, 0.0 }
 0xd95   : > { %2320 = vadd.xlane.f32.xlu1 %v2319_v49 }
 0xd97   : > { %v3448_v50 = vpop.eup %3447 }
 0xd98   : > { %v2322_v51 = vsel %vm999_vm3, %v3448_v50, 0.0 }
 0xd99   : > { %2323 = vadd.xlane.f32.xlu0 %v2322_v51 }
 0xda6   : > { %2205 = vrot.lane.b32.xlu1 %v3870_v19, %s4056_s2 }
 0xdaa   : > { %2330 = vrot.lane.b32.xlu1 %v3870_v19, %s4057_s23 }
 0xdaf   : > { %2080 = vrot.lane.b32.xlu0 %v3870_v19, %s4058_s25 }
 0xe06   : > { %v1946_v52 = vpop.xlane.xlu1 %1945 }
 0xe07   : > { %3449 = vrcp.f32 %v1946_v52 }
 0xe0a   : > { %v1949_v54 = vpop.xlane.xlu0 %1948 }
 0xe0b   : > { %3451 = vrcp.f32 %v1949_v54 }
 0xe0e   : > { %v2071_v56 = vpop.xlane.xlu1 %2070 }
 0xe12   : > { %v2074_v55 = vpop.xlane.xlu0 %2073 }
 0xe13   : > { %3453 = vrcp.f32 %v2074_v55 }
 0xe14   : > { %v3450_v57 = vpop.eup %3449  ;;  %3455 = vrcp.f32 %v2071_v56 }
 0xe15   : > { %v1952_v60 = vmul.f32 %v3450_v57, %v3434_v25 }
 0xe16   : > { %v2196_v63 = vpop.xlane.xlu1 %2195 }
 0xe18   : > { %v3452_v59 = vpop.eup %3451 }
 0xe19   : > { %v1953_v61 = vmul.f32 %v3452_v59, %v3436_v29 }
 0xe1a   : > { %v2199_v62 = vpop.xlane.xlu0 %2198 }
 0xe1b   : > { %v1954_v0 = vpack.c.bf16 %v1953_v61, %v1952_v60  ;;  %3457 = vrcp.f32 %v2199_v62  ;;  %v3041_v61 = vld [vmem:[%s3777_s19 + $0x1] ss:$0 sm:$0xff] }
 0xe1c   : > { %3459 = vrcp.f32 %v2196_v63 }
 0xe1d   : > { %3244 = vmatmul.mubr.msk.bf16.vlgmr.msra.gmra.mxu1 %vm999_vm3, %v1954_v0 }
 0xe1e   : > { %3255 = vmatprep.mubr.msk.bf16.mxu1 %vm3486_vm1, %v3485_v14  ;;  %v2321_v3 = vpop.xlane.xlu1 %2320 }
 0xe20   : > { %v3454_v19 = vpop.eup %3453 }
 0xe21   : > { %v3456_v2 = vpop.eup %3455  ;;  %v2078_v4 = vmul.f32 %v3454_v19, %v3440_v31 }
 0xe22   : > { %v2324_v1 = vpop.xlane.xlu0 %2323  ;;  %v2077_v6 = vmul.f32 %v3456_v2, %v3438_v36  ;;  %v2206_v11 = vpop.permute.xlu1 %2205 }
 0xe23   : > { %3461 = vrcp.f32 %v2324_v1 }
 0xe24   : > { %3463 = vrcp.f32 %v2321_v3  ;;  %v2079_v7 = vpack.c.bf16 %v2078_v4, %v2077_v6 }
 0xe26   : > { %v2081_v5 = vpop.permute.xlu0 %2080  ;;  %v2331_v17 = vpop.permute.xlu1 %2330 }
 0xe27   : > { %3254 = vmatpush3.bf16.msra.mxu1 %v2081_v5 }
 0xe28   : > { %3265 = vmatprep.subr.bf16.mxu1 %v3485_v14  ;;  %v3458_v10 = vpop.eup %3457 }
 0xe29   : > { %v3460_v12 = vpop.eup %3459  ;;  %v2203_v13 = vmul.f32 %v3458_v10, %v3444_v46 }
 0xe2a   : > { %3256 = vmatmul.mubr.msk.bf16.vlgmr.msra.gmra.mxu1 %vm999_vm3, %v2079_v7  ;;  %v2202_v15 = vmul.f32 %v3460_v12, %v3442_v45 }
 0xe2b   : > { %3266 = vmatpush3.bf16.msra.mxu1 %v2206_v11  ;;  %3267 = vmatprep.mubr.msk.bf16.mxu1 %vm3486_vm1, %v3485_v14 }
 0xe2c   : > { %3277 = vmatprep.subr.bf16.mxu1 %v3485_v14  ;;  %v2204_v53 = vpack.c.bf16 %v2203_v13, %v2202_v15 }
 0xe30   : > { %v3462_v16 = vpop.eup %3461 }
 0xe31   : > { %v3464_v18 = vpop.eup %3463  ;;  %v2328_v20 = vmul.f32 %v3462_v16, %v3448_v50 }
 0xe32   : > { %3268 = vmatmul.mubr.msk.bf16.vlgmr.msra.gmra.mxu1 %vm999_vm3, %v2204_v53  ;;  %v2327_v21 = vmul.f32 %v3464_v18, %v3446_v48  ;;  %v3380_v18 = vld [vmem:[%s3631_s27 + $0x10] sm:$0xff]  }
 0xe33   : > { %3278 = vmatpush3.bf16.msra.mxu1 %v2331_v17  ;;  %3279 = vmatprep.mubr.msk.bf16.mxu1 %vm3486_vm1, %v3485_v14 }
 0xe34   : > { %3291 = vmatprep.subr.bf16.mxu1 %v3485_v14  ;;  %v2329_v58 = vpack.c.bf16 %v2328_v20, %v2327_v21 }
 0xe3a   : > { %3280 = vmatmul.mubr.msk.bf16.vlgmr.msra.gmra.mxu1 %vm999_vm3, %v2329_v58 }
 0xe3b   : > { %3295 = vmatprep.mubr.msk.bf16.mxu1 %vm3486_vm1, %v3485_v14 }
 0xedd   : > { %v1995_v22 = vpop.f32.mrf.mxu1 }
 0xedf   : > { %v3245_v23 = vpop.f32.mrf.mxu1 }
 0xee1   : > { %v1998_v24 = vpop.f32.mrf.mxu1 }
 0xee3   : > { %v3246_v25 = vpop.f32.mrf.mxu1 }
 0xeea   : > { %v2120_v41 = vpop.f32.mrf.mxu1 }
 0xeec   : > { %v3257_v26 = vpop.f32.mrf.mxu1 }
 0xeed   : > { %v3047_v26 = vld [vmem:[%s3794_s24 + $0x1] ss:$0 sm:$0xff] }
 0xeee   : > { %v2123_v27 = vpop.f32.mrf.mxu1 }
 0xeef   : > { %v3350_v29 = vpack.i.bf16 %v2123_v27, %v2120_v41 }
 0xef0   : > { %v3258_v30 = vpop.f32.mrf.mxu1 }
 0xef1   : > { %3351 = vrot.lane.b32.xlu1 %v3350_v29, %s4059_s26  ;;  %v3048_v30 = vld [vmem:[%s3801_s30 + $0x1] ss:$0 sm:$0xff]  ;;  %s823_s30 = scalar_lea.vmem %s4023_s16, %s2986_s20 }
 0xef2   : > { %v2245_v33 = vpop.f32.mrf.mxu1 }
 0xef4   : > { %v3269_v34 = vpop.f32.mrf.mxu1 }
 0xef6   : > { %v2248_v36 = vpop.f32.mrf.mxu1 }
 0xef7   : > { %v3355_v37 = vpack.i.bf16 %v2248_v36, %v2245_v33 }
 0xef8   : > { %v3270_v38 = vpop.f32.mrf.mxu1 }
 0xef9   : > { %3356 = vrot.lane.b32.xlu0 %v3355_v37, %s4060_s28  ;;  %v3381_v37 = vld [vmem:[%s3811_s18 + $0x38] sm:$0xff]   ;;  %v3382_v38 = vld [vmem:[%s3811_s18 + $0x30] sm:$0xff]  }
 0xefa   : > { %v2370_v39 = vpop.f32.mrf.mxu1 }
 0xefc   : > { %v3281_v40 = vpop.f32.mrf.mxu1 }
 0xefd   : > { %v3384_v40 = vld [vmem:[%s3811_s18 + $0x20] sm:$0xff]  }
 0xefe   : > { %v2373_v42 = vpop.f32.mrf.mxu1 }
 0xeff   : > { %v3360_v31 = vpack.i.bf16 %v2373_v42, %v2370_v39  ;;  %v3383_v39 = vld [vmem:[%s3811_s18 + $0x28] sm:$0xff]   ;;  %v3054_v42 = vld [vmem:[%s3825_s0 + $0x1] ss:$0 sm:$0xff] }
 0xf00   : > { %v3282_v43 = vpop.f32.mrf.mxu1 }
 0xf01   : > { %3361 = vrot.lane.b32.xlu1 %v3360_v31, %s4061_s17 }
 0xf63   : > { %v3352_v44 = vpop.permute.xlu1 %3351 }
 0xf64   : > { %v3354_v32 = vunpack.i.h.bf16 %v3352_v44  ;;  %v3353_v46 = vunpack.i.l.bf16 %v3352_v44 }
 0xf66   : > { %v2402_v50 = vsel %vm947_vm2, %v1998_v24, %v3354_v32  ;;  %v2401_v51 = vsel %vm947_vm2, %v1995_v22, %v3353_v46 }
 0xf6b   : > { %v3357_v45 = vpop.permute.xlu0 %3356 }
 0xf6c   : > { %v3359_v47 = vunpack.i.h.bf16 %v3357_v45  ;;  %v3358_v48 = vunpack.i.l.bf16 %v3357_v45 }
 0xf6e   : > { %v2404_v55 = vsel %vm999_vm3, %v2402_v50, %v3359_v47  ;;  %v2403_v56 = vsel %vm999_vm3, %v2401_v51, %v3358_v48 }
 0xf73   : > { %v3362_v49 = vpop.permute.xlu1 %3361 }
 0xf74   : > { %v3364_v52 = vunpack.i.h.bf16 %v3362_v49  ;;  %v3363_v54 = vunpack.i.l.bf16 %v3362_v49 }
 0xf76   : > { %v2406_v57 = vsel %vm1473_vm4, %v2404_v55, %v3364_v52  ;;  %v2405_v59 = vsel %vm1473_vm4, %v2403_v56, %v3363_v54 }
 0xf77   : > { %v2412_v60 = vpack.c.bf16 %v2406_v57, %v2405_v59 }
 0xf79   : > { %3288 = vmatmul.mubr.msk.bf16.vlgmr.msra.gmra.mxu0 %vm829_vm0, %v2412_v60 }
 0xf7a   : > { %3307 = vmatprep.mubr.msk.bf16.mxu0 %vm3486_vm1, %v3485_v14  ;;  %3300 = vmatpush3.bf16.msra.mxu0 %v3381_v37  ;;  %v3076_v37 = vld [vmem:[%s3857_s3 + $0x1] ss:$0 sm:$0xff] }
 0xf7b   : > { %3301 = vmatprep.subr.bf16.mxu0 %v3485_v14 }
 0xf7e   : > { %3302 = vmatpush3.bf16.msra.mxu0 %v3382_v38 }
 0xf7f   : > { %3303 = vmatprep.subr.bf16.mxu0 %v3485_v14 }
 0xf82   : > { %3304 = vmatpush3.bf16.msra.mxu0 %v3383_v39 }
 0xf83   : > { %3305 = vmatprep.subr.bf16.mxu0 %v3485_v14 }
 0xf86   : > { %3306 = vmatpush3.bf16.msra.mxu0 %v3384_v40 }
0x1039   : > { %v2470_v62 = vpop.f32.mrf.mxu0 }
0x103a   : > { %v2471_v63 = vadd.f32 %v3041_v61, %v2470_v62 }
0x103b   : > { %v3289_v0 = vpop.f32.mrf.mxu0 }
0x103c   : > { %v2477_v19 = vadd.f32 %v2471_v63, %v3860_v8 }
0x103d   : > { %v2473_v1 = vpop.f32.mrf.mxu0 }
0x103e   : > { %v2474_v2 = vadd.f32 %v3041_v61, %v2473_v1  ;;  %v2483_v3 = vsel %vm829_vm0, %v2477_v19, 0.0 }
0x103f   : > { %2484 = vadd.xlane.f32.xlu0 %v2483_v3  ;;  %v3290_v4 = vpop.f32.mrf.mxu0 }
0x1040   : > { %v2478_v5 = vadd.f32 %v2474_v2, %v3862_v9  ;;  %v3379_v9 = vld [vmem:[%s3631_s27 + $0x18] sm:$0xff]   ;;  %v3067_v2 = vld [vmem:[%s3835_s29 + $0x1] ss:$0 sm:$0xff] }
0x1041   : > { %3292 = vmatpush3.bf16.msra.mxu1 %v3379_v9 }
0x1042   : > { %v2486_v6 = vsel %vm829_vm0, %v2478_v5, 0.0  ;;  %3293 = vmatprep.subr.bf16.mxu1 %v3485_v14 }
0x1043   : > { %2487 = vadd.xlane.f32.xlu1 %v2486_v6 }
0x1045   : > { %3294 = vmatpush3.bf16.msra.mxu1 %v3380_v18 }
0x10c8   : > { %v2485_v7 = vpop.xlane.xlu0 %2484 }
0x10c9   : > { %v2489_v10 = vmul.f32 0.03125, %v2485_v7 }
0x10cb   : > { %v2491_v11 = vsub.f32 %v2477_v19, %v2489_v10 }
0x10cc   : > { %v2488_v12 = vpop.xlane.xlu1 %2487 }
0x10cd   : > { %v2490_v13 = vmul.f32 0.03125, %v2488_v12  ;;  %v2493_v15 = vmul.f32 %v2491_v11, %v2491_v11 }
0x10cf   : > { %v2492_v8 = vsub.f32 %v2478_v5, %v2490_v13  ;;  %v2495_v53 = vsel %vm829_vm0, %v2493_v15, 0.0 }
0x10d0   : > { %2496 = vadd.xlane.f32.xlu0 %v2495_v53 }
0x10d1   : > { %v2494_v16 = vmul.f32 %v2492_v8, %v2492_v8 }
0x10d3   : > { %v2498_v17 = vsel %vm829_vm0, %v2494_v16, 0.0 }
0x10d4   : > { %2499 = vadd.xlane.f32.xlu0 %v2498_v17 }
0x1159   : > { %v2497_v20 = vpop.xlane.xlu0 %2496 }
0x115a   : > { %v2501_v21 = vmul.f32 0.03125, %v2497_v20 }
0x115c   : > { %v2503_v58 = vadd.f32 1e-12, %v2501_v21 }
0x115d   : > { %v2500_v22 = vpop.xlane.xlu0 %2499 }
0x115e   : > { %3465 = vrsqrt.f32 %v2503_v58  ;;  %v2502_v23 = vmul.f32 0.03125, %v2500_v22 }
0x1160   : > { %v2504_v24 = vadd.f32 1e-12, %v2502_v23 }
0x1162   : > { %3467 = vrsqrt.f32 %v2504_v24 }
0x116b   : > { %v3466_v25 = vpop.eup %3465 }
0x116c   : > { %v2507_v41 = vmul.f32 %v3466_v25, %v2491_v11 }
0x116e   : > { %v2515_v29 = vmul.f32 %v3047_v26, %v2507_v41 }
0x116f   : > { %v3468_v27 = vpop.eup %3467 }
0x1170   : > { %v2508_v28 = vmul.f32 %v3468_v27, %v2492_v8  ;;  %v2523_v34 = vadd.f32 %v3048_v30, %v2515_v29 }
0x1172   : > { %v2516_v33 = vmul.f32 %v3047_v26, %v2508_v28 }
0x1174   : > { %v2524_v35 = vadd.f32 %v3048_v30, %v2516_v33  ;;  %v3075_v33 = vld [vmem:[%s3850_s1 + $0x1] ss:$0 sm:$0xff] }
0x1176   : > { %v2530_v36 = vpack.c.bf16 %v2524_v35, %v2523_v34 }
0x1178   : > { %3296 = vmatmul.mubr.msk.bf16.vlgmr.msra.gmra.mxu1 %vm829_vm0, %v2530_v36 }
0x1238   : > { %v2588_v31 = vpop.f32.mrf.mxu1 }
0x1239   : > { %v2589_v43 = vadd.f32 %v3054_v42, %v2588_v31 }
0x123a   : > { %v3297_v44 = vpop.f32.mrf.mxu1 }
0x123b   : > { %v2595_v45 = vmul.f32 %v2589_v43, %v2589_v43 }
0x123c   : > { %v2591_v32 = vpop.f32.mrf.mxu1 }
0x123d   : > { %v2597_v46 = vmul.f32 %v2595_v45, %v2589_v43  ;;  %v2592_v47 = vadd.f32 %v3054_v42, %v2591_v32 }
0x123e   : > { %v3298_v48 = vpop.f32.mrf.mxu1 }
0x123f   : > { %v2599_v49 = vmul.f32 0.044715, %v2597_v46  ;;  %v2596_v50 = vmul.f32 %v2592_v47, %v2592_v47 }
0x1241   : > { %v2601_v51 = vadd.f32 %v2599_v49, %v2589_v43  ;;  %v2598_v52 = vmul.f32 %v2596_v50, %v2592_v47 }
0x1243   : > { %v2603_v54 = vmul.f32 0.7978846, %v2601_v51  ;;  %v2600_v55 = vmul.f32 0.044715, %v2598_v52 }
0x1245   : > { %3469 = vtanh.f32 %v2603_v54  ;;  %v2602_v14 = vadd.f32 %v2600_v55, %v2592_v47 }
0x1247   : > { %v2604_v56 = vmul.f32 0.7978846, %v2602_v14 }
0x1249   : > { %3471 = vtanh.f32 %v2604_v56 }
0x1252   : > { %v3470_v57 = vpop.eup %3469 }
0x1253   : > { %v2607_v59 = vadd.f32 1.0, %v3470_v57 }
0x1255   : > { %v2609_v61 = vmul.f32 0.5, %v2607_v59 }
0x1256   : > { %v3472_v60 = vpop.eup %3471 }
0x1257   : > { %v2608_v62 = vadd.f32 1.0, %v3472_v60  ;;  %v2611_v0 = vmul.f32 %v2609_v61, %v2589_v43 }
0x1259   : > { %v2610_v63 = vmul.f32 0.5, %v2608_v62 }
0x125b   : > { %v2612_v19 = vmul.f32 %v2610_v63, %v2592_v47 }
0x125d   : > { %v2622_v1 = vpack.c.bf16 %v2612_v19, %v2611_v0 }
0x125f   : > { %3308 = vmatmul.mubr.msk.bf16.vlgmr.msra.gmra.mxu0 %vm1716_vm5, %v2622_v1 }
0x131f   : > { %v2692_v3 = vpop.f32.mrf.mxu0 }
0x1320   : > { %v2693_v4 = vadd.f32 %v3067_v2, %v2692_v3 }
0x1321   : > { %v3309_v5 = vpop.f32.mrf.mxu0 }
0x1322   : > { %v2699_v6 = vadd.f32 %v2693_v4, %v2523_v34 }
0x1323   : > { %v2695_v7 = vpop.f32.mrf.mxu0 }
0x1324   : > { %v2696_v10 = vadd.f32 %v3067_v2, %v2695_v7  ;;  %v2705_v11 = vsel %vm829_vm0, %v2699_v6, 0.0 }
0x1325   : > { %2706 = vadd.xlane.f32.xlu1 %v2705_v11  ;;  %v3310_v12 = vpop.f32.mrf.mxu0 }
0x1326   : > { %v2700_v13 = vadd.f32 %v2696_v10, %v2524_v35 }
0x1328   : > { %v2708_v15 = vsel %vm829_vm0, %v2700_v13, 0.0 }
0x1329   : > { %2709 = vadd.xlane.f32.xlu0 %v2708_v15 }
0x13ae   : > { %v2707_v8 = vpop.xlane.xlu1 %2706 }
0x13af   : > { %v2711_v53 = vmul.f32 0.03125, %v2707_v8 }
0x13b1   : > { %v2713_v16 = vsub.f32 %v2699_v6, %v2711_v53 }
0x13b2   : > { %v2710_v17 = vpop.xlane.xlu0 %2709 }
0x13b3   : > { %v2712_v9 = vmul.f32 0.03125, %v2710_v17  ;;  %v2715_v18 = vmul.f32 %v2713_v16, %v2713_v16 }
0x13b5   : > { %v2714_v20 = vsub.f32 %v2700_v13, %v2712_v9  ;;  %v2717_v21 = vsel %vm829_vm0, %v2715_v18, 0.0 }
0x13b6   : > { %2718 = vadd.xlane.f32.xlu0 %v2717_v21 }
0x13b7   : > { %v2716_v58 = vmul.f32 %v2714_v20, %v2714_v20 }
0x13b9   : > { %v2720_v22 = vsel %vm829_vm0, %v2716_v58, 0.0 }
0x13ba   : > { %2721 = vadd.xlane.f32.xlu1 %v2720_v22 }
0x143f   : > { %v2719_v23 = vpop.xlane.xlu0 %2718 }
0x1440   : > { %v2723_v24 = vmul.f32 0.03125, %v2719_v23 }
0x1442   : > { %v2725_v25 = vadd.f32 1e-12, %v2723_v24 }
0x1443   : > { %v2722_v41 = vpop.xlane.xlu1 %2721 }
0x1444   : > { %3473 = vrsqrt.f32 %v2725_v25  ;;  %v2724_v26 = vmul.f32 0.03125, %v2722_v41 }
0x1446   : > { %v2726_v27 = vadd.f32 1e-12, %v2724_v26 }
0x1448   : > { %3475 = vrsqrt.f32 %v2726_v27 }
0x1451   : > { %v3474_v28 = vpop.eup %3473 }
0x1452   : > { %v2729_v29 = vmul.f32 %v3474_v28, %v2713_v16 }
0x1454   : > { %v2737_v35 = vmul.f32 %v3075_v33, %v2729_v29 }
0x1455   : > { %v3476_v30 = vpop.eup %3475 }
0x1456   : > { %v2730_v34 = vmul.f32 %v3476_v30, %v2714_v20  ;;  %v2745_v39 = vadd.f32 %v3076_v37, %v2737_v35 }
0x1458   : > { %v2738_v36 = vmul.f32 %v3075_v33, %v2730_v34 }
0x145a   : > { %v2746_v38 = vadd.f32 %v3076_v37, %v2738_v36 }
0x145c   : > { %v2748_v40 = vrot.slane %v2746_v38, 7 }
0x145e   : > { %v2751_v42 = vsel %vm2750_vm6, %v2745_v39, %v2748_v40 }
0x145f   : > { %2753 = vst.msk [vmem:[%s823_s30] sm:$0x3] %vm2752_vm7, %v2751_v42 }
0x1460 PF: > { %s26_s21 = sadd.s32 1, %s3483_s21  }
0x1461   : > { %p23_p5 = scmp.ge.s32.totalorder %s26_s21, 4  }
0x1463   :  { %25 = sbr.rel (!%p23_p5) target bundleno = 6 (0x6), region = 171 }

</bundles_post_ra>
